<compile_context>
chip_gen: v5e
topology: v5e:2x2
jax: 0.10.0
libtpu: 0.0.40
codegen_flags: <defaults>
</compile_context>

<pallas_src>
import functools

import numpy as np
import jax
import jax.numpy as jnp
from jax.experimental import pallas as pl
from jax.experimental.pallas import tpu as pltpu


def _round_up(x, m):
    return (x + m - 1) // m * m


# ----------------------------------------------------------------------------
# Generic Pallas matmul kernel:
#   out = act( A(rows,K) @ B(K,M) [+ bias(rows,1)] [+ addend(rows,M)] )
# Optional epilogue: ReLU, or grouped softmax along rows (per-anchor class softmax).
# Grid = (M tiles ["parallel"], K tiles ["arbitrary"]).
# ----------------------------------------------------------------------------

def _fused_matmul_kernel(*refs, nk, has_bias, has_addend, relu, softmax_groups):
    pos = 0
    a_ref = refs[pos]; pos += 1
    b_ref = refs[pos]; pos += 1
    bias_ref = refs[pos] if has_bias else None
    pos += 1 if has_bias else 0
    add_ref = refs[pos] if has_addend else None
    pos += 1 if has_addend else 0
    o_ref = refs[pos]
    acc_ref = refs[pos + 1] if nk > 1 else None

    def finalize(acc):
        if has_bias:
            acc = acc + bias_ref[...]            # (rows,1) broadcast along lanes
        if has_addend:
            acc = acc + add_ref[...]
        if relu:
            acc = jnp.maximum(acc, 0.0)
        if softmax_groups is None:
            o_ref[...] = acc
        else:
            start, n_groups, group = softmax_groups
            if start > 0:
                o_ref[:start, :] = acc[:start, :]
            for g in range(n_groups):
                r0 = start + g * group
                blk = acc[r0:r0 + group, :]                       # (group, tm)
                mx = jnp.max(blk, axis=0, keepdims=True)
                e = jnp.exp(blk - mx)                             # EUP
                s = jnp.sum(e, axis=0, keepdims=True)
                o_ref[r0:r0 + group, :] = e * pl.reciprocal(s, approx=True)
            end = start + n_groups * group
            if end < acc.shape[0]:                                # padded rows
                o_ref[end:, :] = acc[end:, :]

    if nk == 1:
        acc = jnp.dot(a_ref[...], b_ref[...], preferred_element_type=jnp.float32)
        finalize(acc)
    else:
        @pl.when(pl.program_id(1) == 0)
        def _():
            acc_ref[...] = jnp.zeros_like(acc_ref)

        acc_ref[...] += jnp.dot(a_ref[...], b_ref[...],
                                preferred_element_type=jnp.float32)

        @pl.when(pl.program_id(1) == nk - 1)
        def _():
            finalize(acc_ref[...])


def fused_matmul(a, b, bias=None, addend=None, *, relu=False, softmax_groups=None,
                 max_tm=512, max_tk=512):
    """Lane-dense matmul: returns (a @ b [+bias] [+addend]) with optional ReLU/softmax."""
    R, K = a.shape
    K2, M = b.shape
    assert K == K2, (a.shape, b.shape)
    Rp = _round_up(R, 8)
    Mp = _round_up(M, 128)
    if K <= max_tk:
        Kp, tk, nk = K, K, 1
    else:
        tk = max_tk
        Kp = _round_up(K, tk)
        nk = Kp // tk
    if Mp <= max_tm:
        tm = Mp
    else:
        tm = max_tm
        while Mp % tm:
            tm -= 128
    nm = Mp // tm

    a_p = jnp.pad(a, ((0, Rp - R), (0, Kp - K)))
    b_p = jnp.pad(b, ((0, Kp - K), (0, Mp - M)))
    args = [a_p, b_p]
    in_specs = [
        pl.BlockSpec((Rp, tk), lambda m, k: (0, k)),
        pl.BlockSpec((tk, tm), lambda m, k: (k, m)),
    ]
    has_bias = bias is not None
    has_addend = addend is not None
    if has_bias:
        args.append(jnp.pad(bias.reshape(R, 1), ((0, Rp - R), (0, 0))))
        in_specs.append(pl.BlockSpec((Rp, 1), lambda m, k: (0, 0)))
    if has_addend:
        args.append(jnp.pad(addend, ((0, Rp - R), (0, Mp - M))))
        in_specs.append(pl.BlockSpec((Rp, tm), lambda m, k: (0, m)))

    kernel = functools.partial(_fused_matmul_kernel, nk=nk, has_bias=has_bias,
                               has_addend=has_addend, relu=relu,
                               softmax_groups=softmax_groups)
    out = pl.pallas_call(
        kernel,
        out_shape=jax.ShapeDtypeStruct((Rp, Mp), jnp.float32),
        grid=(nm, nk),
        in_specs=in_specs,
        out_specs=pl.BlockSpec((Rp, tm), lambda m, k: (0, m)),
        scratch_shapes=([pltpu.VMEM((Rp, tm), jnp.float32)] if nk > 1 else []),
        compiler_params=pltpu.CompilerParams(
            dimension_semantics=("parallel", "arbitrary")),
    )(*args)
    return out[:R, :M]


# ----------------------------------------------------------------------------
# Conv2d: im2col glue (no transposes in CNHW layout) + the fused matmul kernel.
# Activations are stored as (C, N, H, W).
# ----------------------------------------------------------------------------

def _im2col(x, k, stride, pad):
    """x: (C, N, H, W) -> patches (C*k*k, N*Ho*Wo), column order matches w.reshape(Cout,-1)."""
    C, N, H, W = x.shape
    xp = jnp.pad(x, ((0, 0), (0, 0), (pad, pad), (pad, pad)))
    Ho = (H + 2 * pad - k) // stride + 1
    Wo = (W + 2 * pad - k) // stride + 1
    cols = []
    for dy in range(k):
        for dx in range(k):
            cols.append(xp[:, :, dy:dy + (Ho - 1) * stride + 1:stride,
                                 dx:dx + (Wo - 1) * stride + 1:stride])   # (C,N,Ho,Wo)
    patches = jnp.stack(cols, axis=1)                    # (C, k*k, N, Ho, Wo)
    patches = patches.reshape(C * k * k, N * Ho * Wo)    # pure reshape (cin-major, dy, dx)
    return patches, Ho, Wo


def conv2d_packed(x, layer):
    """x: (C, N, H, W); layer holds pre-packed wmat (Cout, C*k*k), bias, k/stride/pad/relu."""
    patches, Ho, Wo = _im2col(x, layer["k"], layer["stride"], layer["pad"])
    out = fused_matmul(layer["wmat"], patches, bias=layer["b"], relu=layer["relu"])
    return out.reshape(layer["wmat"].shape[0], x.shape[1], Ho, Wo)


# ----------------------------------------------------------------------------
# Bilinear upsample (+ lateral add).  F.upsample(mode='bilinear') semantics via a
# precomputed separable interpolation matrix: up[b] = Wh @ x[b] @ Ww^T, i.e.
# out_flat = x_flat @ kron(Wh, Ww)^T  -> a single matmul (+ full addend) Pallas call.
# TODO(synk): align_corners=False (half-pixel) assumed; legacy F.upsample versions used
#             align_corners=True semantics. At large resolutions the kron matrix should be
#             replaced by the separable two-matmul form.
# ----------------------------------------------------------------------------

def _bilinear_matrix(out_size, in_size):
    if out_size == in_size:
        return np.eye(out_size, dtype=np.float32)
    o = np.arange(out_size)
    src = (o + 0.5) * (in_size / out_size) - 0.5
    src = np.maximum(src, 0.0)
    i0 = np.minimum(np.floor(src).astype(np.int64), in_size - 1)
    i1 = np.minimum(i0 + 1, in_size - 1)
    w1 = np.clip(src - i0, 0.0, 1.0).astype(np.float32)
    w0 = (1.0 - w1).astype(np.float32)
    M = np.zeros((out_size, in_size), np.float32)
    np.add.at(M, (o, i0), w0)
    np.add.at(M, (o, i1), w1)
    return M


def upsample_add(x, y):
    """Bilinearly resize x (C,N,Hi,Wi) to y's spatial size and add y (C,N,Ho,Wo)."""
    C, N, Hi, Wi = x.shape
    _, _, Ho, Wo = y.shape
    Wh = _bilinear_matrix(Ho, Hi)                       # (Ho, Hi)
    Ww = _bilinear_matrix(Wo, Wi)                       # (Wo, Wi)
    kup_t = jnp.asarray(np.kron(Wh, Ww).T)              # (Hi*Wi, Ho*Wo)
    x_flat = x.reshape(C * N, Hi * Wi)
    y_flat = y.reshape(C * N, Ho * Wo)
    out = fused_matmul(x_flat, kup_t, addend=y_flat)    # (C*N, Ho*Wo), one pallas_call
    return out.reshape(C, N, Ho, Wo)


# ----------------------------------------------------------------------------
# Parameter construction (deterministic, synthetic -- shapes dictated by __init__),
# with weights pre-reshaped/packed once (conv mats + fused head mats).
# ----------------------------------------------------------------------------

def _conv_weights(key, cout, cin, k):
    wk, bk = jax.random.split(key)
    fan_in = cin * k * k
    w = jax.random.normal(wk, (cout, cin, k, k), jnp.float32) / np.sqrt(fan_in)
    b = 0.01 * jax.random.normal(bk, (cout,), jnp.float32)
    return w, b


def _pack_conv(w, b, *, stride=1, relu=False):
    cout, cin, k, _ = w.shape
    return {"wmat": w.reshape(cout, cin * k * k), "b": b,
            "k": k, "stride": stride, "pad": k // 2, "relu": relu}


def make_retina_params(key, *, in_channels=4, fpn=16, num_anchors=2, num_classes=3):
    keys = jax.random.split(key, 12)
    params = {}
    # base: conv+ReLU stack; feature_layer picks which base outputs form the pyramid
    params["base"] = [
        _pack_conv(*_conv_weights(keys[0], 8, in_channels, 3), stride=1, relu=True),  # 16->16
        _pack_conv(*_conv_weights(keys[1], 16, 8, 3), stride=2, relu=True),           # 16->8 (src)
        _pack_conv(*_conv_weights(keys[2], 32, 16, 3), stride=2, relu=True),          # 8->4  (src)
    ]
    params["feature_layer"] = [1, 2]
    # transforms: 1x1 lateral convs to FPN width
    params["transforms"] = [
        _pack_conv(*_conv_weights(keys[3], fpn, 16, 1)),
        _pack_conv(*_conv_weights(keys[4], fpn, 32, 1)),
    ]
    # extras: [smooth conv (level 0), smooth conv (unused per reference forward),
    #          extra-level stride-2 conv appended to the pyramid]
    params["extras"] = [
        _pack_conv(*_conv_weights(keys[5], fpn, fpn, 3), stride=1),
        _pack_conv(*_conv_weights(keys[6], fpn, fpn, 3), stride=1),
        _pack_conv(*_conv_weights(keys[7], fpn, 32, 3), stride=2),                    # 4->2
    ]
    # shared heads, fused loc+conf (layer2 block-diagonal over the 2*fpn hidden channels)
    wl1, bl1 = _conv_weights(keys[8], fpn, fpn, 3)
    wl2, bl2 = _conv_weights(keys[9], num_anchors * 4, fpn, 3)
    wc1, bc1 = _conv_weights(keys[10], fpn, fpn, 3)
    wc2, bc2 = _conv_weights(keys[11], num_anchors * num_classes, fpn, 3)
    n_loc, n_conf = num_anchors * 4, num_anchors * num_classes
    h1_w = jnp.concatenate([wl1, wc1], axis=0)                     # (2*fpn, fpn, 3, 3)
    params["head1_wmat"] = h1_w.reshape(2 * fpn, fpn * 9)
    params["head1_b"] = jnp.concatenate([bl1, bc1])
    h2_w = jnp.zeros((n_loc + n_conf, 2 * fpn, 3, 3), jnp.float32)
    h2_w = h2_w.at[:n_loc, :fpn].set(wl2)
    h2_w = h2_w.at[n_loc:, fpn:].set(wc2)
    params["head2_wmat"] = h2_w.reshape(n_loc + n_conf, 2 * fpn * 9)
    params["head2_b"] = jnp.concatenate([bl2, bc2])
    params["n_loc_ch"] = n_loc
    params["num_anchors"] = num_anchors
    params["num_classes"] = num_classes
    params["fpn"] = fpn
    return params


# ----------------------------------------------------------------------------
# Fused detection heads: 2 matmul calls total (all levels concatenated along M,
# loc+conf fused along rows, class softmax fused into the last epilogue in eval).
# ----------------------------------------------------------------------------

def _fused_heads(params, sources, apply_softmax):
    fpn2 = params["head1_wmat"].shape[0]          # 2*fpn hidden channels
    n_loc = params["n_loc_ch"]
    level_shapes = [(s.shape[1], s.shape[2], s.shape[3]) for s in sources]

    p1 = [_im2col(s, 3, 1, 1)[0] for s in sources]          # each (fpn*9, M_l)
    m_sizes = [p.shape[1] for p in p1]
    hidden = fused_matmul(params["head1_wmat"], jnp.concatenate(p1, axis=1),
                          bias=params["head1_b"], relu=True)  # (2*fpn, Mtot)

    p2, off = [], 0
    for (n, h, w), m in zip(level_shapes, m_sizes):
        p2.append(_im2col(hidden[:, off:off + m].reshape(fpn2, n, h, w), 3, 1, 1)[0])
        off += m
    sm = ((n_loc, params["num_anchors"], params["num_classes"])
          if apply_softmax else None)
    out = fused_matmul(params["head2_wmat"], jnp.concatenate(p2, axis=1),
                       bias=params["head2_b"], relu=False,
                       softmax_groups=sm)                     # (A*4 + A*C, Mtot)

    loc_parts, conf_parts, off = [], [], 0
    for (n, h, w), m in zip(level_shapes, m_sizes):
        blk = out[:, off:off + m]
        loc_l = blk[:n_loc].reshape(n_loc, n, h, w)
        conf_l = blk[n_loc:].reshape(-1, n, h, w)
        # matches PyTorch .permute(0,2,3,1).contiguous().view(N,-1)
        loc_parts.append(jnp.transpose(loc_l, (1, 2, 3, 0)).reshape(n, -1))
        conf_parts.append(jnp.transpose(conf_l, (1, 2, 3, 0)).reshape(n, -1))
        off += m
    return jnp.concatenate(loc_parts, axis=1), jnp.concatenate(conf_parts, axis=1)


# ----------------------------------------------------------------------------
# Retina forward (mirrors the PyTorch forward)
# ----------------------------------------------------------------------------

def retina_forward(params, x_nchw, phase="eval"):
    x = jnp.transpose(x_nchw, (1, 0, 2, 3))      # NCHW -> internal CNHW (one transpose)
    n = x.shape[1]

    sources = []
    for k, layer in enumerate(params["base"]):
        x = conv2d_packed(x, layer)
        if k in params["feature_layer"]:
            sources.append(x)

    # top-down FPN path
    xx = None
    for i in range(len(sources))[::-1]:
        lat = conv2d_packed(sources[i], params["transforms"][i])
        if i != len(sources) - 1:
            xx = conv2d_packed(upsample_add(xx, lat), params["extras"][i])
        else:
            xx = lat
        sources[i] = xx

    # extra pyramid levels from the remaining extras, applied to the last base output
    for i, layer in enumerate(params["extras"]):
        if i >= len(sources):
            x = conv2d_packed(x, layer)
            sources.append(x)

    if phase == "feature":
        return [jnp.transpose(s, (1, 0, 2, 3)) for s in sources]   # back to NCHW

    loc, conf = _fused_heads(params, sources, apply_softmax=(phase == "eval"))
    if phase == "eval":
        return loc.reshape(n, -1, 4), conf.reshape(-1, params["num_classes"])
    return loc.reshape(n, -1, 4), conf.reshape(n, -1, params["num_classes"])


# ----------------------------------------------------------------------------
if __name__ == "__main__":
    key = jax.random.PRNGKey(0)
    pkey, xkey = jax.random.split(key)
    params = make_retina_params(pkey, in_channels=4, fpn=16, num_anchors=2, num_classes=3)

    x = jax.random.normal(xkey, (2, 4, 16, 16), jnp.float32)   # NCHW, like PyTorch

    fwd = jax.jit(lambda inp: retina_forward(params, inp, phase="eval"))
    loc, conf = fwd(x)
    loc = jax.block_until_ready(loc)
    conf = jax.block_until_ready(conf)

    # sanity checks: anchors = 2 * (8*8 + 4*4 + 2*2) = 168 per image
    assert loc.shape == (2, 168, 4), loc.shape
    assert conf.shape == (2 * 168, 3), conf.shape
    assert bool(jnp.all(jnp.isfinite(loc))) and bool(jnp.all(jnp.isfinite(conf)))
    # softmax rows sum to 1 (approx EUP reciprocal -> loose tolerance)
    assert bool(jnp.allclose(jnp.sum(conf, axis=-1), 1.0, atol=1e-2))
    assert bool(jnp.all(conf >= 0.0)) and bool(jnp.all(conf <= 1.001))

    print("KERNEL_OK")
</pallas_src>

<mosaic_0001>
module attributes {stable_mosaic.version = 11 : i64} {
  func.func @_fused_matmul_kernel(%arg0: i32, %arg1: i32, %arg2: memref<8x36xf32, #tpu.memory_space<vmem>>, %arg3: memref<36x512xf32, #tpu.memory_space<vmem>>, %arg4: memref<8x1xf32, #tpu.memory_space<vmem>>, %arg5: memref<8x512xf32, #tpu.memory_space<vmem>>) attributes {dimension_semantics = [#tpu.dimension_semantics<parallel>, #tpu.dimension_semantics<arbitrary>], iteration_bounds = array<i64: 1, 1>, scalar_prefetch = 0 : i64, scratch_operands = 0 : i64, tpu.core_type = #tpu.core_type<tc>, window_params = [{transform_indices = @transform_0, window_bounds = array<i64: 8, 36>}, {transform_indices = @transform_1, window_bounds = array<i64: 36, 512>}, {pipeline_mode = #tpu.pipeline_mode<synchronous>, transform_indices = @transform_2, window_bounds = array<i64: 8, 1>}, {transform_indices = @transform_3, window_bounds = array<i64: 8, 512>}]} {
    %c0 = arith.constant 0 : index
    %c0_0 = arith.constant 0 : index
    %0 = vector.load %arg2[%c0, %c0_0] : memref<8x36xf32, #tpu.memory_space<vmem>>, vector<8x36xf32>
    %c0_1 = arith.constant 0 : index
    %c0_2 = arith.constant 0 : index
    %1 = vector.load %arg3[%c0_1, %c0_2] : memref<36x512xf32, #tpu.memory_space<vmem>>, vector<36x512xf32>
    %cst = arith.constant dense<0.000000e+00> : vector<8x512xf32>
    %2 = tpu.matmul %0, %1, %cst {dimension_numbers = #tpu.dot_dimension_numbers<[1], [0], [0], [1], [0, 0, 1, 1], [], []>} : vector<8x36xf32>, vector<36x512xf32>, vector<8x512xf32> -> vector<8x512xf32>
    %c0_3 = arith.constant 0 : index
    %c0_4 = arith.constant 0 : index
    %3 = vector.load %arg4[%c0_3, %c0_4] : memref<8x1xf32, #tpu.memory_space<vmem>>, vector<8x1xf32>
    %4 = vector.broadcast %3 : vector<8x1xf32> to vector<8x512xf32>
    %5 = arith.addf %2, %4 : vector<8x512xf32>
    %cst_5 = arith.constant 0.000000e+00 : f32
    %6 = vector.broadcast %cst_5 : f32 to vector<8x512xf32>
    %7 = arith.maximumf %5, %6 : vector<8x512xf32>
    %c0_6 = arith.constant 0 : index
    %c0_7 = arith.constant 0 : index
    %8 = vector.load %arg5[%c0_6, %c0_7] : memref<8x512xf32, #tpu.memory_space<vmem>>, vector<8x512xf32>
    tpu.vector_store %arg5[%c0_6, %c0_7], %7 {strides = array<i32>} : memref<8x512xf32, #tpu.memory_space<vmem>>, vector<8x512xf32>,
    return
  }
  func.func @transform_0(%arg0: i32, %arg1: i32) -> (i32, i32) {
    %c0_i32 = arith.constant 0 : i32
    %c0_i32_0 = arith.constant 0 : i32
    return %c0_i32, %arg1 : i32, i32
  }
  func.func @transform_1(%arg0: i32, %arg1: i32) -> (i32, i32) {
    %c0_i32 = arith.constant 0 : i32
    return %arg1, %arg0 : i32, i32
  }
  func.func @transform_2(%arg0: i32, %arg1: i32) -> (i32, i32) {
    %c0_i32 = arith.constant 0 : i32
    %c0_i32_0 = arith.constant 0 : i32
    %c0_i32_1 = arith.constant 0 : i32
    return %c0_i32, %c0_i32_0 : i32, i32
  }
  func.func @transform_3(%arg0: i32, %arg1: i32) -> (i32, i32) {
    %c0_i32 = arith.constant 0 : i32
    %c0_i32_0 = arith.constant 0 : i32
    return %c0_i32, %arg0 : i32, i32
  }
}

module attributes {stable_mosaic.version = 11 : i64} {
  func.func @_fused_matmul_kernel(%arg0: i32, %arg1: i32, %arg2: memref<16x72xf32, #tpu.memory_space<vmem>>, %arg3: memref<72x128xf32, #tpu.memory_space<vmem>>, %arg4: memref<16x1xf32, #tpu.memory_space<vmem>>, %arg5: memref<16x128xf32, #tpu.memory_space<vmem>>) attributes {dimension_semantics = [#tpu.dimension_semantics<parallel>, #tpu.dimension_semantics<arbitrary>], iteration_bounds = array<i64: 1, 1>, scalar_prefetch = 0 : i64, scratch_operands = 0 : i64, tpu.core_type = #tpu.core_type<tc>, window_params = [{transform_indices = @transform_0, window_bounds = array<i64: 16, 72>}, {transform_indices = @transform_1, window_bounds = array<i64: 72, 128>}, {pipeline_mode = #tpu.pipeline_mode<synchronous>, transform_indices = @transform_2, window_bounds = array<i64: 16, 1>}, {transform_indices = @transform_3, window_bounds = array<i64: 16, 128>}]} {
    %c0 = arith.constant 0 : index
    %c0_0 = arith.constant 0 : index
    %0 = vector.load %arg2[%c0, %c0_0] : memref<16x72xf32, #tpu.memory_space<vmem>>, vector<16x72xf32>
    %c0_1 = arith.constant 0 : index
    %c0_2 = arith.constant 0 : index
    %1 = vector.load %arg3[%c0_1, %c0_2] : memref<72x128xf32, #tpu.memory_space<vmem>>, vector<72x128xf32>
    %cst = arith.constant dense<0.000000e+00> : vector<16x128xf32>
    %2 = tpu.matmul %0, %1, %cst {dimension_numbers = #tpu.dot_dimension_numbers<[1], [0], [0], [1], [0, 0, 1, 1], [], []>} : vector<16x72xf32>, vector<72x128xf32>, vector<16x128xf32> -> vector<16x128xf32>
    %c0_3 = arith.constant 0 : index
    %c0_4 = arith.constant 0 : index
    %3 = vector.load %arg4[%c0_3, %c0_4] : memref<16x1xf32, #tpu.memory_space<vmem>>, vector<16x1xf32>
    %4 = vector.broadcast %3 : vector<16x1xf32> to vector<16x128xf32>
    %5 = arith.addf %2, %4 : vector<16x128xf32>
    %cst_5 = arith.constant 0.000000e+00 : f32
    %6 = vector.broadcast %cst_5 : f32 to vector<16x128xf32>
    %7 = arith.maximumf %5, %6 : vector<16x128xf32>
    %c0_6 = arith.constant 0 : index
    %c0_7 = arith.constant 0 : index
    %8 = vector.load %arg5[%c0_6, %c0_7] : memref<16x128xf32, #tpu.memory_space<vmem>>, vector<16x128xf32>
    tpu.vector_store %arg5[%c0_6, %c0_7], %7 {strides = array<i32>} : memref<16x128xf32, #tpu.memory_space<vmem>>, vector<16x128xf32>,
    return
  }
  func.func @transform_0(%arg0: i32, %arg1: i32) -> (i32, i32) {
    %c0_i32 = arith.constant 0 : i32
    %c0_i32_0 = arith.constant 0 : i32
    return %c0_i32, %arg1 : i32, i32
  }
  func.func @transform_1(%arg0: i32, %arg1: i32) -> (i32, i32) {
    %c0_i32 = arith.constant 0 : i32
    return %arg1, %arg0 : i32, i32
  }
  func.func @transform_2(%arg0: i32, %arg1: i32) -> (i32, i32) {
    %c0_i32 = arith.constant 0 : i32
    %c0_i32_0 = arith.constant 0 : i32
    %c0_i32_1 = arith.constant 0 : i32
    return %c0_i32, %c0_i32_0 : i32, i32
  }
  func.func @transform_3(%arg0: i32, %arg1: i32) -> (i32, i32) {
    %c0_i32 = arith.constant 0 : i32
    %c0_i32_0 = arith.constant 0 : i32
    return %c0_i32, %arg0 : i32, i32
  }
}

module attributes {stable_mosaic.version = 11 : i64} {
  func.func @_fused_matmul_kernel(%arg0: i32, %arg1: i32, %arg2: memref<16x32xf32, #tpu.memory_space<vmem>>, %arg3: memref<32x128xf32, #tpu.memory_space<vmem>>, %arg4: memref<16x1xf32, #tpu.memory_space<vmem>>, %arg5: memref<16x128xf32, #tpu.memory_space<vmem>>) attributes {dimension_semantics = [#tpu.dimension_semantics<parallel>, #tpu.dimension_semantics<arbitrary>], iteration_bounds = array<i64: 1, 1>, scalar_prefetch = 0 : i64, scratch_operands = 0 : i64, tpu.core_type = #tpu.core_type<tc>, window_params = [{transform_indices = @transform_0, window_bounds = array<i64: 16, 32>}, {transform_indices = @transform_1, window_bounds = array<i64: 32, 128>}, {pipeline_mode = #tpu.pipeline_mode<synchronous>, transform_indices = @transform_2, window_bounds = array<i64: 16, 1>}, {transform_indices = @transform_3, window_bounds = array<i64: 16, 128>}]} {
    %c0 = arith.constant 0 : index
    %c0_0 = arith.constant 0 : index
    %0 = vector.load %arg2[%c0, %c0_0] : memref<16x32xf32, #tpu.memory_space<vmem>>, vector<16x32xf32>
    %c0_1 = arith.constant 0 : index
    %c0_2 = arith.constant 0 : index
    %1 = vector.load %arg3[%c0_1, %c0_2] : memref<32x128xf32, #tpu.memory_space<vmem>>, vector<32x128xf32>
    %cst = arith.constant dense<0.000000e+00> : vector<16x128xf32>
    %2 = tpu.matmul %0, %1, %cst {dimension_numbers = #tpu.dot_dimension_numbers<[1], [0], [0], [1], [0, 0, 1, 1], [], []>} : vector<16x32xf32>, vector<32x128xf32>, vector<16x128xf32> -> vector<16x128xf32>
    %c0_3 = arith.constant 0 : index
    %c0_4 = arith.constant 0 : index
    %3 = vector.load %arg4[%c0_3, %c0_4] : memref<16x1xf32, #tpu.memory_space<vmem>>, vector<16x1xf32>
    %4 = vector.broadcast %3 : vector<16x1xf32> to vector<16x128xf32>
    %5 = arith.addf %2, %4 : vector<16x128xf32>
    %c0_5 = arith.constant 0 : index
    %c0_6 = arith.constant 0 : index
    %6 = vector.load %arg5[%c0_5, %c0_6] : memref<16x128xf32, #tpu.memory_space<vmem>>, vector<16x128xf32>
    tpu.vector_store %arg5[%c0_5, %c0_6], %5 {strides = array<i32>} : memref<16x128xf32, #tpu.memory_space<vmem>>, vector<16x128xf32>,
    return
  }
  func.func @transform_0(%arg0: i32, %arg1: i32) -> (i32, i32) {
    %c0_i32 = arith.constant 0 : i32
    %c0_i32_0 = arith.constant 0 : i32
    return %c0_i32, %arg1 : i32, i32
  }
  func.func @transform_1(%arg0: i32, %arg1: i32) -> (i32, i32) {
    %c0_i32 = arith.constant 0 : i32
    return %arg1, %arg0 : i32, i32
  }
  func.func @transform_2(%arg0: i32, %arg1: i32) -> (i32, i32) {
    %c0_i32 = arith.constant 0 : i32
    %c0_i32_0 = arith.constant 0 : i32
    %c0_i32_1 = arith.constant 0 : i32
    return %c0_i32, %c0_i32_0 : i32, i32
  }
  func.func @transform_3(%arg0: i32, %arg1: i32) -> (i32, i32) {
    %c0_i32 = arith.constant 0 : i32
    %c0_i32_0 = arith.constant 0 : i32
    return %c0_i32, %arg0 : i32, i32
  }
}

module attributes {stable_mosaic.version = 11 : i64} {
  func.func @_fused_matmul_kernel(%arg0: i32, %arg1: i32, %arg2: memref<32x144xf32, #tpu.memory_space<vmem>>, %arg3: memref<144x128xf32, #tpu.memory_space<vmem>>, %arg4: memref<32x1xf32, #tpu.memory_space<vmem>>, %arg5: memref<32x128xf32, #tpu.memory_space<vmem>>) attributes {dimension_semantics = [#tpu.dimension_semantics<parallel>, #tpu.dimension_semantics<arbitrary>], iteration_bounds = array<i64: 1, 1>, scalar_prefetch = 0 : i64, scratch_operands = 0 : i64, tpu.core_type = #tpu.core_type<tc>, window_params = [{transform_indices = @transform_0, window_bounds = array<i64: 32, 144>}, {transform_indices = @transform_1, window_bounds = array<i64: 144, 128>}, {pipeline_mode = #tpu.pipeline_mode<synchronous>, transform_indices = @transform_2, window_bounds = array<i64: 32, 1>}, {transform_indices = @transform_3, window_bounds = array<i64: 32, 128>}]} {
    %c0 = arith.constant 0 : index
    %c0_0 = arith.constant 0 : index
    %0 = vector.load %arg2[%c0, %c0_0] : memref<32x144xf32, #tpu.memory_space<vmem>>, vector<32x144xf32>
    %c0_1 = arith.constant 0 : index
    %c0_2 = arith.constant 0 : index
    %1 = vector.load %arg3[%c0_1, %c0_2] : memref<144x128xf32, #tpu.memory_space<vmem>>, vector<144x128xf32>
    %cst = arith.constant dense<0.000000e+00> : vector<32x128xf32>
    %2 = tpu.matmul %0, %1, %cst {dimension_numbers = #tpu.dot_dimension_numbers<[1], [0], [0], [1], [0, 0, 1, 1], [], []>} : vector<32x144xf32>, vector<144x128xf32>, vector<32x128xf32> -> vector<32x128xf32>
    %c0_3 = arith.constant 0 : index
    %c0_4 = arith.constant 0 : index
    %3 = vector.load %arg4[%c0_3, %c0_4] : memref<32x1xf32, #tpu.memory_space<vmem>>, vector<32x1xf32>
    %4 = vector.broadcast %3 : vector<32x1xf32> to vector<32x128xf32>
    %5 = arith.addf %2, %4 : vector<32x128xf32>
    %cst_5 = arith.constant 0.000000e+00 : f32
    %6 = vector.broadcast %cst_5 : f32 to vector<32x128xf32>
    %7 = arith.maximumf %5, %6 : vector<32x128xf32>
    %c0_6 = arith.constant 0 : index
    %c0_7 = arith.constant 0 : index
    %8 = vector.load %arg5[%c0_6, %c0_7] : memref<32x128xf32, #tpu.memory_space<vmem>>, vector<32x128xf32>
    tpu.vector_store %arg5[%c0_6, %c0_7], %7 {strides = array<i32>} : memref<32x128xf32, #tpu.memory_space<vmem>>, vector<32x128xf32>,
    return
  }
  func.func @transform_0(%arg0: i32, %arg1: i32) -> (i32, i32) {
    %c0_i32 = arith.constant 0 : i32
    %c0_i32_0 = arith.constant 0 : i32
    return %c0_i32, %arg1 : i32, i32
  }
  func.func @transform_1(%arg0: i32, %arg1: i32) -> (i32, i32) {
    %c0_i32 = arith.constant 0 : i32
    return %arg1, %arg0 : i32, i32
  }
  func.func @transform_2(%arg0: i32, %arg1: i32) -> (i32, i32) {
    %c0_i32 = arith.constant 0 : i32
    %c0_i32_0 = arith.constant 0 : i32
    %c0_i32_1 = arith.constant 0 : i32
    return %c0_i32, %c0_i32_0 : i32, i32
  }
  func.func @transform_3(%arg0: i32, %arg1: i32) -> (i32, i32) {
    %c0_i32 = arith.constant 0 : i32
    %c0_i32_0 = arith.constant 0 : i32
    return %c0_i32, %arg0 : i32, i32
  }
}

module attributes {stable_mosaic.version = 11 : i64} {
  func.func @_fused_matmul_kernel(%arg0: i32, %arg1: i32, %arg2: memref<16x16xf32, #tpu.memory_space<vmem>>, %arg3: memref<16x128xf32, #tpu.memory_space<vmem>>, %arg4: memref<16x1xf32, #tpu.memory_space<vmem>>, %arg5: memref<16x128xf32, #tpu.memory_space<vmem>>) attributes {dimension_semantics = [#tpu.dimension_semantics<parallel>, #tpu.dimension_semantics<arbitrary>], iteration_bounds = array<i64: 1, 1>, scalar_prefetch = 0 : i64, scratch_operands = 0 : i64, tpu.core_type = #tpu.core_type<tc>, window_params = [{transform_indices = @transform_0, window_bounds = array<i64: 16, 16>}, {transform_indices = @transform_1, window_bounds = array<i64: 16, 128>}, {pipeline_mode = #tpu.pipeline_mode<synchronous>, transform_indices = @transform_2, window_bounds = array<i64: 16, 1>}, {transform_indices = @transform_3, window_bounds = array<i64: 16, 128>}]} {
    %c0 = arith.constant 0 : index
    %c0_0 = arith.constant 0 : index
    %0 = vector.load %arg2[%c0, %c0_0] : memref<16x16xf32, #tpu.memory_space<vmem>>, vector<16x16xf32>
    %c0_1 = arith.constant 0 : index
    %c0_2 = arith.constant 0 : index
    %1 = vector.load %arg3[%c0_1, %c0_2] : memref<16x128xf32, #tpu.memory_space<vmem>>, vector<16x128xf32>
    %cst = arith.constant dense<0.000000e+00> : vector<16x128xf32>
    %2 = tpu.matmul %0, %1, %cst {dimension_numbers = #tpu.dot_dimension_numbers<[1], [0], [0], [1], [0, 0, 1, 1], [], []>} : vector<16x16xf32>, vector<16x128xf32>, vector<16x128xf32> -> vector<16x128xf32>
    %c0_3 = arith.constant 0 : index
    %c0_4 = arith.constant 0 : index
    %3 = vector.load %arg4[%c0_3, %c0_4] : memref<16x1xf32, #tpu.memory_space<vmem>>, vector<16x1xf32>
    %4 = vector.broadcast %3 : vector<16x1xf32> to vector<16x128xf32>
    %5 = arith.addf %2, %4 : vector<16x128xf32>
    %c0_5 = arith.constant 0 : index
    %c0_6 = arith.constant 0 : index
    %6 = vector.load %arg5[%c0_5, %c0_6] : memref<16x128xf32, #tpu.memory_space<vmem>>, vector<16x128xf32>
    tpu.vector_store %arg5[%c0_5, %c0_6], %5 {strides = array<i32>} : memref<16x128xf32, #tpu.memory_space<vmem>>, vector<16x128xf32>,
    return
  }
  func.func @transform_0(%arg0: i32, %arg1: i32) -> (i32, i32) {
    %c0_i32 = arith.constant 0 : i32
    %c0_i32_0 = arith.constant 0 : i32
    return %c0_i32, %arg1 : i32, i32
  }
  func.func @transform_1(%arg0: i32, %arg1: i32) -> (i32, i32) {
    %c0_i32 = arith.constant 0 : i32
    return %arg1, %arg0 : i32, i32
  }
  func.func @transform_2(%arg0: i32, %arg1: i32) -> (i32, i32) {
    %c0_i32 = arith.constant 0 : i32
    %c0_i32_0 = arith.constant 0 : i32
    %c0_i32_1 = arith.constant 0 : i32
    return %c0_i32, %c0_i32_0 : i32, i32
  }
  func.func @transform_3(%arg0: i32, %arg1: i32) -> (i32, i32) {
    %c0_i32 = arith.constant 0 : i32
    %c0_i32_0 = arith.constant 0 : i32
    return %c0_i32, %arg0 : i32, i32
  }
}

module attributes {stable_mosaic.version = 11 : i64} {
  func.func @_fused_matmul_kernel(%arg0: i32, %arg1: i32, %arg2: memref<32x16xf32, #tpu.memory_space<vmem>>, %arg3: memref<16x128xf32, #tpu.memory_space<vmem>>, %arg4: memref<32x128xf32, #tpu.memory_space<vmem>>, %arg5: memref<32x128xf32, #tpu.memory_space<vmem>>) attributes {dimension_semantics = [#tpu.dimension_semantics<parallel>, #tpu.dimension_semantics<arbitrary>], iteration_bounds = array<i64: 1, 1>, scalar_prefetch = 0 : i64, scratch_operands = 0 : i64, tpu.core_type = #tpu.core_type<tc>, window_params = [{transform_indices = @transform_0, window_bounds = array<i64: 32, 16>}, {transform_indices = @transform_1, window_bounds = array<i64: 16, 128>}, {transform_indices = @transform_2, window_bounds = array<i64: 32, 128>}, {transform_indices = @transform_3, window_bounds = array<i64: 32, 128>}]} {
    %c0 = arith.constant 0 : index
    %c0_0 = arith.constant 0 : index
    %0 = vector.load %arg2[%c0, %c0_0] : memref<32x16xf32, #tpu.memory_space<vmem>>, vector<32x16xf32>
    %c0_1 = arith.constant 0 : index
    %c0_2 = arith.constant 0 : index
    %1 = vector.load %arg3[%c0_1, %c0_2] : memref<16x128xf32, #tpu.memory_space<vmem>>, vector<16x128xf32>
    %cst = arith.constant dense<0.000000e+00> : vector<32x128xf32>
    %2 = tpu.matmul %0, %1, %cst {dimension_numbers = #tpu.dot_dimension_numbers<[1], [0], [0], [1], [0, 0, 1, 1], [], []>} : vector<32x16xf32>, vector<16x128xf32>, vector<32x128xf32> -> vector<32x128xf32>
    %c0_3 = arith.constant 0 : index
    %c0_4 = arith.constant 0 : index
    %3 = vector.load %arg4[%c0_3, %c0_4] : memref<32x128xf32, #tpu.memory_space<vmem>>, vector<32x128xf32>
    %4 = arith.addf %2, %3 : vector<32x128xf32>
    %c0_5 = arith.constant 0 : index
    %c0_6 = arith.constant 0 : index
    %5 = vector.load %arg5[%c0_5, %c0_6] : memref<32x128xf32, #tpu.memory_space<vmem>>, vector<32x128xf32>
    tpu.vector_store %arg5[%c0_5, %c0_6], %4 {strides = array<i32>} : memref<32x128xf32, #tpu.memory_space<vmem>>, vector<32x128xf32>,
    return
  }
  func.func @transform_0(%arg0: i32, %arg1: i32) -> (i32, i32) {
    %c0_i32 = arith.constant 0 : i32
    %c0_i32_0 = arith.constant 0 : i32
    return %c0_i32, %arg1 : i32, i32
  }
  func.func @transform_1(%arg0: i32, %arg1: i32) -> (i32, i32) {
    %c0_i32 = arith.constant 0 : i32
    return %arg1, %arg0 : i32, i32
  }
  func.func @transform_2(%arg0: i32, %arg1: i32) -> (i32, i32) {
    %c0_i32 = arith.constant 0 : i32
    %c0_i32_0 = arith.constant 0 : i32
    return %c0_i32, %arg0 : i32, i32
  }
  func.func @transform_3(%arg0: i32, %arg1: i32) -> (i32, i32) {
    %c0_i32 = arith.constant 0 : i32
    %c0_i32_0 = arith.constant 0 : i32
    return %c0_i32, %arg0 : i32, i32
  }
}

module attributes {stable_mosaic.version = 11 : i64} {
  func.func @_fused_matmul_kernel(%arg0: i32, %arg1: i32, %arg2: memref<16x144xf32, #tpu.memory_space<vmem>>, %arg3: memref<144x128xf32, #tpu.memory_space<vmem>>, %arg4: memref<16x1xf32, #tpu.memory_space<vmem>>, %arg5: memref<16x128xf32, #tpu.memory_space<vmem>>) attributes {dimension_semantics = [#tpu.dimension_semantics<parallel>, #tpu.dimension_semantics<arbitrary>], iteration_bounds = array<i64: 1, 1>, scalar_prefetch = 0 : i64, scratch_operands = 0 : i64, tpu.core_type = #tpu.core_type<tc>, window_params = [{transform_indices = @transform_0, window_bounds = array<i64: 16, 144>}, {transform_indices = @transform_1, window_bounds = array<i64: 144, 128>}, {pipeline_mode = #tpu.pipeline_mode<synchronous>, transform_indices = @transform_2, window_bounds = array<i64: 16, 1>}, {transform_indices = @transform_3, window_bounds = array<i64: 16, 128>}]} {
    %c0 = arith.constant 0 : index
    %c0_0 = arith.constant 0 : index
    %0 = vector.load %arg2[%c0, %c0_0] : memref<16x144xf32, #tpu.memory_space<vmem>>, vector<16x144xf32>
    %c0_1 = arith.constant 0 : index
    %c0_2 = arith.constant 0 : index
    %1 = vector.load %arg3[%c0_1, %c0_2] : memref<144x128xf32, #tpu.memory_space<vmem>>, vector<144x128xf32>
    %cst = arith.constant dense<0.000000e+00> : vector<16x128xf32>
    %2 = tpu.matmul %0, %1, %cst {dimension_numbers = #tpu.dot_dimension_numbers<[1], [0], [0], [1], [0, 0, 1, 1], [], []>} : vector<16x144xf32>, vector<144x128xf32>, vector<16x128xf32> -> vector<16x128xf32>
    %c0_3 = arith.constant 0 : index
    %c0_4 = arith.constant 0 : index
    %3 = vector.load %arg4[%c0_3, %c0_4] : memref<16x1xf32, #tpu.memory_space<vmem>>, vector<16x1xf32>
    %4 = vector.broadcast %3 : vector<16x1xf32> to vector<16x128xf32>
    %5 = arith.addf %2, %4 : vector<16x128xf32>
    %c0_5 = arith.constant 0 : index
    %c0_6 = arith.constant 0 : index
    %6 = vector.load %arg5[%c0_5, %c0_6] : memref<16x128xf32, #tpu.memory_space<vmem>>, vector<16x128xf32>
    tpu.vector_store %arg5[%c0_5, %c0_6], %5 {strides = array<i32>} : memref<16x128xf32, #tpu.memory_space<vmem>>, vector<16x128xf32>,
    return
  }
  func.func @transform_0(%arg0: i32, %arg1: i32) -> (i32, i32) {
    %c0_i32 = arith.constant 0 : i32
    %c0_i32_0 = arith.constant 0 : i32
    return %c0_i32, %arg1 : i32, i32
  }
  func.func @transform_1(%arg0: i32, %arg1: i32) -> (i32, i32) {
    %c0_i32 = arith.constant 0 : i32
    return %arg1, %arg0 : i32, i32
  }
  func.func @transform_2(%arg0: i32, %arg1: i32) -> (i32, i32) {
    %c0_i32 = arith.constant 0 : i32
    %c0_i32_0 = arith.constant 0 : i32
    %c0_i32_1 = arith.constant 0 : i32
    return %c0_i32, %c0_i32_0 : i32, i32
  }
  func.func @transform_3(%arg0: i32, %arg1: i32) -> (i32, i32) {
    %c0_i32 = arith.constant 0 : i32
    %c0_i32_0 = arith.constant 0 : i32
    return %c0_i32, %arg0 : i32, i32
  }
}

module attributes {stable_mosaic.version = 11 : i64} {
  func.func @_fused_matmul_kernel(%arg0: i32, %arg1: i32, %arg2: memref<16x288xf32, #tpu.memory_space<vmem>>, %arg3: memref<288x128xf32, #tpu.memory_space<vmem>>, %arg4: memref<16x1xf32, #tpu.memory_space<vmem>>, %arg5: memref<16x128xf32, #tpu.memory_space<vmem>>) attributes {dimension_semantics = [#tpu.dimension_semantics<parallel>, #tpu.dimension_semantics<arbitrary>], iteration_bounds = array<i64: 1, 1>, scalar_prefetch = 0 : i64, scratch_operands = 0 : i64, tpu.core_type = #tpu.core_type<tc>, window_params = [{transform_indices = @transform_0, window_bounds = array<i64: 16, 288>}, {transform_indices = @transform_1, window_bounds = array<i64: 288, 128>}, {pipeline_mode = #tpu.pipeline_mode<synchronous>, transform_indices = @transform_2, window_bounds = array<i64: 16, 1>}, {transform_indices = @transform_3, window_bounds = array<i64: 16, 128>}]} {
    %c0 = arith.constant 0 : index
    %c0_0 = arith.constant 0 : index
    %0 = vector.load %arg2[%c0, %c0_0] : memref<16x288xf32, #tpu.memory_space<vmem>>, vector<16x288xf32>
    %c0_1 = arith.constant 0 : index
    %c0_2 = arith.constant 0 : index
    %1 = vector.load %arg3[%c0_1, %c0_2] : memref<288x128xf32, #tpu.memory_space<vmem>>, vector<288x128xf32>
    %cst = arith.constant dense<0.000000e+00> : vector<16x128xf32>
    %2 = tpu.matmul %0, %1, %cst {dimension_numbers = #tpu.dot_dimension_numbers<[1], [0], [0], [1], [0, 0, 1, 1], [], []>} : vector<16x288xf32>, vector<288x128xf32>, vector<16x128xf32> -> vector<16x128xf32>
    %c0_3 = arith.constant 0 : index
    %c0_4 = arith.constant 0 : index
    %3 = vector.load %arg4[%c0_3, %c0_4] : memref<16x1xf32, #tpu.memory_space<vmem>>, vector<16x1xf32>
    %4 = vector.broadcast %3 : vector<16x1xf32> to vector<16x128xf32>
    %5 = arith.addf %2, %4 : vector<16x128xf32>
    %c0_5 = arith.constant 0 : index
    %c0_6 = arith.constant 0 : index
    %6 = vector.load %arg5[%c0_5, %c0_6] : memref<16x128xf32, #tpu.memory_space<vmem>>, vector<16x128xf32>
    tpu.vector_store %arg5[%c0_5, %c0_6], %5 {strides = array<i32>} : memref<16x128xf32, #tpu.memory_space<vmem>>, vector<16x128xf32>,
    return
  }
  func.func @transform_0(%arg0: i32, %arg1: i32) -> (i32, i32) {
    %c0_i32 = arith.constant 0 : i32
    %c0_i32_0 = arith.constant 0 : i32
    return %c0_i32, %arg1 : i32, i32
  }
  func.func @transform_1(%arg0: i32, %arg1: i32) -> (i32, i32) {
    %c0_i32 = arith.constant 0 : i32
    return %arg1, %arg0 : i32, i32
  }
  func.func @transform_2(%arg0: i32, %arg1: i32) -> (i32, i32) {
    %c0_i32 = arith.constant 0 : i32
    %c0_i32_0 = arith.constant 0 : i32
    %c0_i32_1 = arith.constant 0 : i32
    return %c0_i32, %c0_i32_0 : i32, i32
  }
  func.func @transform_3(%arg0: i32, %arg1: i32) -> (i32, i32) {
    %c0_i32 = arith.constant 0 : i32
    %c0_i32_0 = arith.constant 0 : i32
    return %c0_i32, %arg0 : i32, i32
  }
}

module attributes {stable_mosaic.version = 11 : i64} {
  func.func @_fused_matmul_kernel(%arg0: i32, %arg1: i32, %arg2: memref<32x144xf32, #tpu.memory_space<vmem>>, %arg3: memref<144x256xf32, #tpu.memory_space<vmem>>, %arg4: memref<32x1xf32, #tpu.memory_space<vmem>>, %arg5: memref<32x256xf32, #tpu.memory_space<vmem>>) attributes {dimension_semantics = [#tpu.dimension_semantics<parallel>, #tpu.dimension_semantics<arbitrary>], iteration_bounds = array<i64: 1, 1>, scalar_prefetch = 0 : i64, scratch_operands = 0 : i64, tpu.core_type = #tpu.core_type<tc>, window_params = [{transform_indices = @transform_0, window_bounds = array<i64: 32, 144>}, {transform_indices = @transform_1, window_bounds = array<i64: 144, 256>}, {pipeline_mode = #tpu.pipeline_mode<synchronous>, transform_indices = @transform_2, window_bounds = array<i64: 32, 1>}, {transform_indices = @transform_3, window_bounds = array<i64: 32, 256>}]} {
    %c0 = arith.constant 0 : index
    %c0_0 = arith.constant 0 : index
    %0 = vector.load %arg2[%c0, %c0_0] : memref<32x144xf32, #tpu.memory_space<vmem>>, vector<32x144xf32>
    %c0_1 = arith.constant 0 : index
    %c0_2 = arith.constant 0 : index
    %1 = vector.load %arg3[%c0_1, %c0_2] : memref<144x256xf32, #tpu.memory_space<vmem>>, vector<144x256xf32>
    %cst = arith.constant dense<0.000000e+00> : vector<32x256xf32>
    %2 = tpu.matmul %0, %1, %cst {dimension_numbers = #tpu.dot_dimension_numbers<[1], [0], [0], [1], [0, 0, 1, 1], [], []>} : vector<32x144xf32>, vector<144x256xf32>, vector<32x256xf32> -> vector<32x256xf32>
    %c0_3 = arith.constant 0 : index
    %c0_4 = arith.constant 0 : index
    %3 = vector.load %arg4[%c0_3, %c0_4] : memref<32x1xf32, #tpu.memory_space<vmem>>, vector<32x1xf32>
    %4 = vector.broadcast %3 : vector<32x1xf32> to vector<32x256xf32>
    %5 = arith.addf %2, %4 : vector<32x256xf32>
    %cst_5 = arith.constant 0.000000e+00 : f32
    %6 = vector.broadcast %cst_5 : f32 to vector<32x256xf32>
    %7 = arith.maximumf %5, %6 : vector<32x256xf32>
    %c0_6 = arith.constant 0 : index
    %c0_7 = arith.constant 0 : index
    %8 = vector.load %arg5[%c0_6, %c0_7] : memref<32x256xf32, #tpu.memory_space<vmem>>, vector<32x256xf32>
    tpu.vector_store %arg5[%c0_6, %c0_7], %7 {strides = array<i32>} : memref<32x256xf32, #tpu.memory_space<vmem>>, vector<32x256xf32>,
    return
  }
  func.func @transform_0(%arg0: i32, %arg1: i32) -> (i32, i32) {
    %c0_i32 = arith.constant 0 : i32
    %c0_i32_0 = arith.constant 0 : i32
    return %c0_i32, %arg1 : i32, i32
  }
  func.func @transform_1(%arg0: i32, %arg1: i32) -> (i32, i32) {
    %c0_i32 = arith.constant 0 : i32
    return %arg1, %arg0 : i32, i32
  }
  func.func @transform_2(%arg0: i32, %arg1: i32) -> (i32, i32) {
    %c0_i32 = arith.constant 0 : i32
    %c0_i32_0 = arith.constant 0 : i32
    %c0_i32_1 = arith.constant 0 : i32
    return %c0_i32, %c0_i32_0 : i32, i32
  }
  func.func @transform_3(%arg0: i32, %arg1: i32) -> (i32, i32) {
    %c0_i32 = arith.constant 0 : i32
    %c0_i32_0 = arith.constant 0 : i32
    return %c0_i32, %arg0 : i32, i32
  }
}

module attributes {stable_mosaic.version = 11 : i64} {
  func.func @_fused_matmul_kernel(%arg0: i32, %arg1: i32, %arg2: memref<16x288xf32, #tpu.memory_space<vmem>>, %arg3: memref<288x256xf32, #tpu.memory_space<vmem>>, %arg4: memref<16x1xf32, #tpu.memory_space<vmem>>, %arg5: memref<16x256xf32, #tpu.memory_space<vmem>>) attributes {dimension_semantics = [#tpu.dimension_semantics<parallel>, #tpu.dimension_semantics<arbitrary>], iteration_bounds = array<i64: 1, 1>, scalar_prefetch = 0 : i64, scratch_operands = 0 : i64, tpu.core_type = #tpu.core_type<tc>, window_params = [{transform_indices = @transform_0, window_bounds = array<i64: 16, 288>}, {transform_indices = @transform_1, window_bounds = array<i64: 288, 256>}, {pipeline_mode = #tpu.pipeline_mode<synchronous>, transform_indices = @transform_2, window_bounds = array<i64: 16, 1>}, {transform_indices = @transform_3, window_bounds = array<i64: 16, 256>}]} {
    %c0 = arith.constant 0 : index
    %c0_0 = arith.constant 0 : index
    %0 = vector.load %arg2[%c0, %c0_0] : memref<16x288xf32, #tpu.memory_space<vmem>>, vector<16x288xf32>
    %c0_1 = arith.constant 0 : index
    %c0_2 = arith.constant 0 : index
    %1 = vector.load %arg3[%c0_1, %c0_2] : memref<288x256xf32, #tpu.memory_space<vmem>>, vector<288x256xf32>
    %cst = arith.constant dense<0.000000e+00> : vector<16x256xf32>
    %2 = tpu.matmul %0, %1, %cst {dimension_numbers = #tpu.dot_dimension_numbers<[1], [0], [0], [1], [0, 0, 1, 1], [], []>} : vector<16x288xf32>, vector<288x256xf32>, vector<16x256xf32> -> vector<16x256xf32>
    %c0_3 = arith.constant 0 : index
    %c0_4 = arith.constant 0 : index
    %3 = vector.load %arg4[%c0_3, %c0_4] : memref<16x1xf32, #tpu.memory_space<vmem>>, vector<16x1xf32>
    %4 = vector.broadcast %3 : vector<16x1xf32> to vector<16x256xf32>
    %5 = arith.addf %2, %4 : vector<16x256xf32>
    %6 = vector.extract_strided_slice %5 {offsets = [0, 0], sizes = [8, 256], strides = [1, 1]} : vector<16x256xf32> to vector<8x256xf32>
    %c0_5 = arith.constant 0 : index
    %c0_6 = arith.constant 0 : index
    %7 = vector.load %arg5[%c0_5, %c0_6] : memref<16x256xf32, #tpu.memory_space<vmem>>, vector<8x256xf32>
    tpu.vector_store %arg5[%c0_5, %c0_6], %6 {strides = array<i32>} : memref<16x256xf32, #tpu.memory_space<vmem>>, vector<8x256xf32>,
    %8 = vector.extract_strided_slice %5 {offsets = [8, 0], sizes = [3, 256], strides = [1, 1]} : vector<16x256xf32> to vector<3x256xf32>
    %cst_7 = arith.constant dense<0xFF800000> : vector<256xf32>
    %9 = vector.multi_reduction <maximumf>, %8, %cst_7 [0] : vector<3x256xf32> to vector<256xf32>
    %10 = vector.shape_cast %9 : vector<256xf32> to vector<1x256xf32>
    %11 = vector.broadcast %10 : vector<1x256xf32> to vector<3x256xf32>
    %12 = arith.subf %8, %11 : vector<3x256xf32>
    %13 = math.exp %12 : vector<3x256xf32>
    %cst_8 = arith.constant dense<0.000000e+00> : vector<256xf32>
    %14 = vector.multi_reduction <add>, %13, %cst_8 [0] : vector<3x256xf32> to vector<256xf32>
    %15 = vector.shape_cast %14 : vector<256xf32> to vector<1x256xf32>
    %16 = tpu.reciprocal %15 {approx = true} : vector<1x256xf32> -> vector<1x256xf32>
    %17 = vector.broadcast %16 : vector<1x256xf32> to vector<3x256xf32>
    %18 = arith.mulf %13, %17 : vector<3x256xf32>
    %c8 = arith.constant 8 : index
    %c0_9 = arith.constant 0 : index
    %19 = vector.load %arg5[%c8, %c0_9] : memref<16x256xf32, #tpu.memory_space<vmem>>, vector<3x256xf32>
    tpu.vector_store %arg5[%c8, %c0_9], %18 {strides = array<i32>} : memref<16x256xf32, #tpu.memory_space<vmem>>, vector<3x256xf32>,
    %20 = vector.extract_strided_slice %5 {offsets = [11, 0], sizes = [3, 256], strides = [1, 1]} : vector<16x256xf32> to vector<3x256xf32>
    %cst_10 = arith.constant dense<0xFF800000> : vector<256xf32>
    %21 = vector.multi_reduction <maximumf>, %20, %cst_10 [0] : vector<3x256xf32> to vector<256xf32>
    %22 = vector.shape_cast %21 : vector<256xf32> to vector<1x256xf32>
    %23 = vector.broadcast %22 : vector<1x256xf32> to vector<3x256xf32>
    %24 = arith.subf %20, %23 : vector<3x256xf32>
    %25 = math.exp %24 : vector<3x256xf32>
    %cst_11 = arith.constant dense<0.000000e+00> : vector<256xf32>
    %26 = vector.multi_reduction <add>, %25, %cst_11 [0] : vector<3x256xf32> to vector<256xf32>
    %27 = vector.shape_cast %26 : vector<256xf32> to vector<1x256xf32>
    %28 = tpu.reciprocal %27 {approx = true} : vector<1x256xf32> -> vector<1x256xf32>
    %29 = vector.broadcast %28 : vector<1x256xf32> to vector<3x256xf32>
    %30 = arith.mulf %25, %29 : vector<3x256xf32>
    %c11 = arith.constant 11 : index
    %c0_12 = arith.constant 0 : index
    %31 = vector.load %arg5[%c11, %c0_12] : memref<16x256xf32, #tpu.memory_space<vmem>>, vector<3x256xf32>
    tpu.vector_store %arg5[%c11, %c0_12], %30 {strides = array<i32>} : memref<16x256xf32, #tpu.memory_space<vmem>>, vector<3x256xf32>,
    %32 = vector.extract_strided_slice %5 {offsets = [14, 0], sizes = [2, 256], strides = [1, 1]} : vector<16x256xf32> to vector<2x256xf32>
    %c14 = arith.constant 14 : index
    %c0_13 = arith.constant 0 : index
    %33 = vector.load %arg5[%c14, %c0_13] : memref<16x256xf32, #tpu.memory_space<vmem>>, vector<2x256xf32>
    tpu.vector_store %arg5[%c14, %c0_13], %32 {strides = array<i32>} : memref<16x256xf32, #tpu.memory_space<vmem>>, vector<2x256xf32>,
    return
  }
  func.func @transform_0(%arg0: i32, %arg1: i32) -> (i32, i32) {
    %c0_i32 = arith.constant 0 : i32
    %c0_i32_0 = arith.constant 0 : i32
    return %c0_i32, %arg1 : i32, i32
  }
  func.func @transform_1(%arg0: i32, %arg1: i32) -> (i32, i32) {
    %c0_i32 = arith.constant 0 : i32
    return %arg1, %arg0 : i32, i32
  }
  func.func @transform_2(%arg0: i32, %arg1: i32) -> (i32, i32) {
    %c0_i32 = arith.constant 0 : i32
    %c0_i32_0 = arith.constant 0 : i32
    %c0_i32_1 = arith.constant 0 : i32
    return %c0_i32, %c0_i32_0 : i32, i32
  }
  func.func @transform_3(%arg0: i32, %arg1: i32) -> (i32, i32) {
    %c0_i32 = arith.constant 0 : i32
    %c0_i32_0 = arith.constant 0 : i32
    return %c0_i32, %arg0 : i32, i32
  }
}

</mosaic_0001>

<bundles_post_ra>
// kernel: _lambda_.10
= control target key start
LH: loop header
LB: loop body
LE: loop exit
PB: predicated region body
PF: predicated region fallthrough
CT: control target
= control target key end

     0   :  { %vm45_vm0 = vcmask 1043456   ;;  %v160_v3 = vmov 0   ;;  %vm41_vm1 = vcmask 293888   ;;  %s267_s1 = inlined_call_operand.vmem [shape: f32[36,512], index: 1, kind: input, shape index: {}]   ;;  %s268_s0 = inlined_call_operand.vmem [shape: f32[8,36], index: 0, kind: input, shape index: {}]   ;;  %s269_s2 = inlined_call_operand.vmem [shape: f32[8,1], index: 2, kind: input, shape index: {}]   ;;  %s270_s3 = inlined_call_operand.vmem [shape: f32[8,512], index: 3, kind: output, shape index: {}]  }
   0x1   :  { %v33_v0 = vld [vmem:[%s267_s1 + $0x90] sm:$0xf]  ;;  %v34_v1 = vld [vmem:[%s267_s1 + $0x98] sm:$0xf]  ;;  %159 = vset.pattern.permute.xlu0 %v160_v3  ;;  %v31_v7 = vld [vmem:[%s267_s1 + $0x80] sm:$0xf] }
   0x2   :  { %v29_v2 = vld [vmem:[%s267_s1 + $0x70] sm:$0xff]  ;;  %154 = vmatpush.msk.msra.mxu2 %vm45_vm0, %v33_v0  ;;  %156 = vmatpush.msk.msra.mxu3 %vm45_vm0, %v34_v1  ;;  %v30_v4 = vld [vmem:[%s267_s1 + $0x78] sm:$0xff]  ;;  %v32_v8 = vld [vmem:[%s267_s1 + $0x88] sm:$0xf] }
   0x3   :  { %v25_v5 = vld [vmem:[%s267_s1 + $0x50] sm:$0xff]  ;;  %v26_v6 = vld [vmem:[%s267_s1 + $0x58] sm:$0xff]  ;;  %v27_v9 = vld [vmem:[%s267_s1 + $0x60] sm:$0xff]  ;;  %150 = vmatpush.msk.msra.mxu0 %vm45_vm0, %v31_v7  ;;  %152 = vmatpush.msk.msra.mxu1 %vm45_vm0, %v32_v8 }
   0x4   :  { %110 = vmatpush.msra.mxu2 %v29_v2  ;;  %130 = vmatpush.msra.mxu3 %v30_v4  ;;  %v28_v10 = vld [vmem:[%s267_s1 + $0x68] sm:$0xff]  ;;  %v21_v11 = vld [vmem:[%s267_s1 + $0x30] sm:$0xff]  ;;  %v22_v12 = vld [vmem:[%s267_s1 + $0x38] sm:$0xff] }
   0x5   :  { %v23_v13 = vld [vmem:[%s267_s1 + $0x40] sm:$0xff]  ;;  %v24_v14 = vld [vmem:[%s267_s1 + $0x48] sm:$0xff]  ;;  %70 = vmatpush.msra.mxu0 %v27_v9  ;;  %90 = vmatpush.msra.mxu1 %v28_v10  ;;  %v17_v15 = vld [vmem:[%s267_s1 + $0x10] sm:$0xff] }
   0x6   :  { %111 = vmatpush.msra.mxu2 %v25_v5  ;;  %131 = vmatpush.msra.mxu3 %v26_v6  ;;  %v18_v16 = vld [vmem:[%s267_s1 + $0x18] sm:$0xff]  ;;  %v14_v17 = vld [vmem:[%s268_s0] sm:$0xff]  ;;  %v20_v19 = vld [vmem:[%s267_s1 + $0x28] sm:$0xff] }
   0x7   :  { %71 = vmatpush.msra.mxu0 %v23_v13  ;;  %91 = vmatpush.msra.mxu1 %v24_v14  ;;  %v19_v18 = vld [vmem:[%s267_s1 + $0x20] sm:$0xff]  ;;  %v16_v22 = vld [vmem:[%s267_s1 + $0x8] sm:$0xff] }
   0x8   :  { %112 = vmatpush.msra.mxu2 %v21_v11  ;;  %132 = vmatpush.msra.mxu3 %v22_v12  ;;  %v35_v20 = vld [vmem:[%s269_s2] sm:$0xff] }
   0x9   :  { %v15_v21 = vld [vmem:[%s267_s1] sm:$0xff]  ;;  %72 = vmatpush.msra.mxu0 %v19_v18  ;;  %92 = vmatpush.msra.mxu1 %v20_v19 }
   0xa   :  { %113 = vmatpush.msra.mxu2 %v17_v15  ;;  %133 = vmatpush.msra.mxu3 %v18_v16 }
   0xb   :  { %155 = vmatmul.msk.f32.vlgmr.msra.gmra.mxu2 %vm41_vm1, %v14_v17  ;;  %157 = vmatmul.msk.f32.vlgmr.msra.gmra.mxu3 %vm41_vm1, %v14_v17 }
   0xc   :  { %38 = vperm.xlu0 %159, %v35_v20   ;;  %73 = vmatpush.msra.mxu0 %v15_v21 }
   0xd   :  { %93 = vmatpush.msra.mxu1 %v16_v22  ;;  %151 = vmatmul.msk.f32.vlgmr.msra.gmra.mxu0 %vm41_vm1, %v14_v17 }
   0xe   :  { %153 = vmatmul.msk.f32.vlgmr.msra.gmra.mxu1 %vm41_vm1, %v14_v17 }
  0x7e   :  { %v39_v23 = vpop.permute.xlu0 %38 }
  0x8a   :  { %v75_v24 = vpop.f32.mrf.mxu0 }
  0x8b   :  { %v95_v25 = vpop.f32.mrf.mxu1  ;;  %v76_v26 = vadd.f32 %v75_v24, %v39_v23 }
  0x8c   :  { %v96_v27 = vadd.f32 %v95_v25, %v39_v23 }
  0x8d   :  { %v138_v30 = vmax.f32 %v76_v26, 0.0 }
  0x8e   :  { %v115_v28 = vpop.f32.mrf.mxu2  ;;  %v135_v29 = vpop.f32.mrf.mxu3  ;;  %v139_v31 = vmax.f32 %v96_v27, 0.0 }
  0x8f   :  { %v116_v32 = vadd.f32 %v115_v28, %v39_v23  ;;  %v136_v33 = vadd.f32 %v135_v29, %v39_v23  ;;  %142 = vst [vmem:[%s270_s3] sm:$0xff] %v138_v30 }
  0x90   :  { %143 = vst [vmem:[%s270_s3 + $0x8] sm:$0xff] %v139_v31 }
  0x91   :  { %v140_v34 = vmax.f32 %v116_v32, 0.0  ;;  %v141_v35 = vmax.f32 %v136_v33, 0.0 }
  0x93   :  { %144 = vst [vmem:[%s270_s3 + $0x10] sm:$0xff] %v140_v34 }
  0x94   :  { %145 = vst [vmem:[%s270_s3 + $0x18] sm:$0xff] %v141_v35 }

// kernel: _lambda_.11
= control target key start
LH: loop header
LB: loop body
LE: loop exit
PB: predicated region body
PF: predicated region fallthrough
CT: control target
= control target key end

     0   :  { %v88_v2 = vmov 0   ;;  %vm37_vm0 = vcmask 588800   ;;  %s154_s1 = inlined_call_operand.vmem [shape: f32[72,128], index: 1, kind: input, shape index: {}]   ;;  %s155_s2 = inlined_call_operand.vmem [shape: f32[16,1], index: 2, kind: input, shape index: {}]   ;;  %s156_s0 = inlined_call_operand.vmem [shape: f32[16,72], index: 0, kind: input, shape index: {}]   ;;  %s157_s3 = inlined_call_operand.vmem [shape: f32[16,128], index: 3, kind: output, shape index: {}]  }
   0x1   :  { %v24_v0 = vld [vmem:[%s154_s1 + $0x40] sm:$0xff]  ;;  %v23_v1 = vld [vmem:[%s154_s1 + $0x38] sm:$0xff]  ;;  %87 = vset.pattern.permute.xlu0 %v88_v2  ;;  %v22_v3 = vld [vmem:[%s154_s1 + $0x30] sm:$0xff] }
   0x2   :  { %51 = vmatpush.msra.mxu0 %v24_v0  ;;  %77 = vmatpush.msra.mxu1 %v24_v0  ;;  %v25_v4 = vld [vmem:[%s155_s2] sm:$0xff]  ;;  %v21_v5 = vld [vmem:[%s154_s1 + $0x28] sm:$0xff]  ;;  %v19_v7 = vld [vmem:[%s154_s1 + $0x18] sm:$0xff] }
   0x3   :  { %29 = vperm.xlu0 %87, %v25_v4   ;;  %v20_v6 = vld [vmem:[%s154_s1 + $0x20] sm:$0xff]  ;;  %v26_v8 = vld [vmem:[%s155_s2 + $0x8] sm:$0xff]  ;;  %v18_v9 = vld [vmem:[%s154_s1 + $0x10] sm:$0xff] }
   0x4   :  { %52 = vmatpush.msra.mxu0 %v23_v1  ;;  %78 = vmatpush.msra.mxu1 %v23_v1  ;;  %v17_v10 = vld [vmem:[%s154_s1 + $0x8] sm:$0xff]  ;;  %v16_v11 = vld [vmem:[%s154_s1] sm:$0xff] }
   0x5   :  { %v14_v12 = vld [vmem:[%s156_s0] sm:$0xff]  ;;  %v15_v13 = vld [vmem:[%s156_s0 + $0x8] sm:$0xff] }
   0x6   :  { %53 = vmatpush.msra.mxu0 %v22_v3  ;;  %79 = vmatpush.msra.mxu1 %v22_v3 }
   0x8   :  { %54 = vmatpush.msra.mxu0 %v21_v5  ;;  %80 = vmatpush.msra.mxu1 %v21_v5 }
   0xa   :  { %55 = vmatpush.msra.mxu0 %v20_v6  ;;  %81 = vmatpush.msra.mxu1 %v20_v6 }
   0xb   :  { %34 = vperm.xlu0 %87, %v26_v8  }
   0xc   :  { %56 = vmatpush.msra.mxu0 %v19_v7  ;;  %82 = vmatpush.msra.mxu1 %v19_v7 }
   0xe   :  { %57 = vmatpush.msra.mxu0 %v18_v9  ;;  %83 = vmatpush.msra.mxu1 %v18_v9 }
  0x10   :  { %58 = vmatpush.msra.mxu0 %v17_v10  ;;  %84 = vmatpush.msra.mxu1 %v17_v10 }
  0x12   :  { %59 = vmatpush.msra.mxu0 %v16_v11  ;;  %85 = vmatpush.msra.mxu1 %v16_v11 }
  0x13   :  { %75 = vmatmul.msk.f32.vlgmr.msra.gmra.mxu0 %vm37_vm0, %v14_v12  ;;  %76 = vmatmul.msk.f32.vlgmr.msra.gmra.mxu1 %vm37_vm0, %v15_v13 }
  0x75   :  { %v30_v14 = vpop.permute.xlu0 %29 }
  0x7d   :  { %v35_v15 = vpop.permute.xlu0 %34 }
  0x90   :  { %v61_v16 = vpop.f32.mrf.mxu0  ;;  %v64_v17 = vpop.f32.mrf.mxu1 }
  0x91   :  { %v62_v18 = vadd.f32 %v61_v16, %v30_v14  ;;  %v65_v19 = vadd.f32 %v64_v17, %v35_v15 }
  0x93   :  { %v67_v20 = vmax.f32 %v62_v18, 0.0  ;;  %v68_v21 = vmax.f32 %v65_v19, 0.0 }
  0x95   :  { %69 = vst [vmem:[%s157_s3] sm:$0xff] %v67_v20 }
  0x96   :  { %70 = vst [vmem:[%s157_s3 + $0x8] sm:$0xff] %v68_v21 }

// kernel: _lambda_.13
= control target key start
LH: loop header
LB: loop body
LE: loop exit
PB: predicated region body
PF: predicated region fallthrough
CT: control target
= control target key end

     0   :  { %v76_v1 = vmov 0   ;;  %vm32_vm0 = vcmask 261120   ;;  %s127_s1 = inlined_call_operand.vmem [shape: f32[32,128], index: 1, kind: input, shape index: {}]   ;;  %s128_s2 = inlined_call_operand.vmem [shape: f32[16,1], index: 2, kind: input, shape index: {}]   ;;  %s129_s0 = inlined_call_operand.vmem [shape: f32[16,32], index: 0, kind: input, shape index: {}]   ;;  %s130_s3 = inlined_call_operand.vmem [shape: f32[16,128], index: 3, kind: output, shape index: {}]  }
   0x1   :  { %v19_v0 = vld [vmem:[%s127_s1 + $0x18] sm:$0xff]  ;;  %75 = vset.pattern.permute.xlu0 %v76_v1  ;;  %v20_v2 = vld [vmem:[%s128_s2] sm:$0xff]  ;;  %v18_v3 = vld [vmem:[%s127_s1 + $0x10] sm:$0xff] }
   0x2   :  { %51 = vmatpush.msra.mxu0 %v19_v0  ;;  %70 = vmatpush.msra.mxu1 %v19_v0  ;;  %v17_v4 = vld [vmem:[%s127_s1 + $0x8] sm:$0xff]  ;;  %v16_v5 = vld [vmem:[%s127_s1] sm:$0xff] }
   0x3   :  { %24 = vperm.xlu0 %75, %v20_v2   ;;  %v14_v6 = vld [vmem:[%s129_s0] sm:$0xff]  ;;  %v15_v7 = vld [vmem:[%s129_s0 + $0x8] sm:$0xff] }
   0x4   :  { %52 = vmatpush.msra.mxu0 %v18_v3  ;;  %71 = vmatpush.msra.mxu1 %v18_v3  ;;  %v21_v8 = vld [vmem:[%s128_s2 + $0x8] sm:$0xff] }
   0x6   :  { %53 = vmatpush.msra.mxu0 %v17_v4  ;;  %72 = vmatpush.msra.mxu1 %v17_v4 }
   0x8   :  { %54 = vmatpush.msra.mxu0 %v16_v5  ;;  %73 = vmatpush.msra.mxu1 %v16_v5 }
   0x9   :  { %68 = vmatmul.msk.f32.vlgmr.msra.gmra.mxu0 %vm32_vm0, %v14_v6  ;;  %69 = vmatmul.msk.f32.vlgmr.msra.gmra.mxu1 %vm32_vm0, %v15_v7 }
   0xb   :  { %29 = vperm.xlu0 %75, %v21_v8  }
  0x75   :  { %v25_v9 = vpop.permute.xlu0 %24 }
  0x7d   :  { %v30_v10 = vpop.permute.xlu0 %29 }
  0x86   :  { %v56_v11 = vpop.f32.mrf.mxu0  ;;  %v59_v12 = vpop.f32.mrf.mxu1 }
  0x87   :  { %v57_v13 = vadd.f32 %v56_v11, %v25_v9  ;;  %v60_v14 = vadd.f32 %v59_v12, %v30_v10 }
  0x89   :  { %62 = vst [vmem:[%s130_s3] sm:$0xff] %v57_v13 }
  0x8a   :  { %63 = vst [vmem:[%s130_s3 + $0x8] sm:$0xff] %v60_v14 }

// kernel: _lambda_.12
= control target key start
LH: loop header
LB: loop body
LE: loop exit
PB: predicated region body
PF: predicated region fallthrough
CT: control target
= control target key end

     0   :  { %v186_v3 = vmov 0   ;;  %vm64_vm0 = vcmask 130048   ;;  %s313_s1 = inlined_call_operand.vmem [shape: f32[144,128], index: 1, kind: input, shape index: {}]   ;;  %s314_s0 = inlined_call_operand.vmem [shape: f32[32,144], index: 0, kind: input, shape index: {}]   ;;  %s315_s2 = inlined_call_operand.vmem [shape: f32[32,1], index: 2, kind: input, shape index: {}]   ;;  %s316_s3 = inlined_call_operand.vmem [shape: f32[32,128], index: 3, kind: output, shape index: {}]  }
   0x1   :  { %v37_v0 = vld [vmem:[%s313_s1 + $0x78] sm:$0xff]  ;;  %v36_v1 = vld [vmem:[%s313_s1 + $0x70] sm:$0xff]  ;;  %v35_v2 = vld [vmem:[%s313_s1 + $0x68] sm:$0xff]  ;;  %185 = vset.pattern.permute.xlu1 %v186_v3  ;;  %184 = vset.pattern.permute.xlu0 %v186_v3 }
   0x2   :  { %77 = vmatpush.msra.mxu0 %v37_v0  ;;  %151 = vmatpush.msra.mxu2 %v37_v0  ;;  %v39_v4 = vld [vmem:[%s313_s1 + $0x88] sm:$0xff]  ;;  %v34_v5 = vld [vmem:[%s313_s1 + $0x60] sm:$0xff]  ;;  %v33_v8 = vld [vmem:[%s313_s1 + $0x58] sm:$0xff] }
   0x3   :  { %152 = vmatpush.msra.mxu3 %v37_v0  ;;  %120 = vmatpush.msra.mxu1 %v39_v4  ;;  %v38_v6 = vld [vmem:[%s313_s1 + $0x80] sm:$0xff]  ;;  %v15_v7 = vld [vmem:[%s314_s0 + $0x8] sm:$0xff]  ;;  %v32_v9 = vld [vmem:[%s313_s1 + $0x50] sm:$0xff] }
   0x4   :  { %78 = vmatpush.msra.mxu0 %v36_v1  ;;  %153 = vmatpush.msra.mxu2 %v36_v1  ;;  %v42_v10 = vld [vmem:[%s315_s2 + $0x10] sm:$0xff]  ;;  %v31_v11 = vld [vmem:[%s313_s1 + $0x48] sm:$0xff]  ;;  %v40_v12 = vld [vmem:[%s315_s2] sm:$0xff] }
   0x5   :  { %154 = vmatpush.msra.mxu3 %v36_v1  ;;  %121 = vmatpush.msra.mxu1 %v38_v6  ;;  %v30_v13 = vld [vmem:[%s313_s1 + $0x40] sm:$0xff]  ;;  %v17_v14 = vld [vmem:[%s314_s0 + $0x18] sm:$0xff]  ;;  %v28_v16 = vld [vmem:[%s313_s1 + $0x30] sm:$0xff] }
   0x6   :  { %79 = vmatpush.msra.mxu0 %v35_v2  ;;  %155 = vmatpush.msra.mxu2 %v35_v2  ;;  %v29_v15 = vld [vmem:[%s313_s1 + $0x38] sm:$0xff]  ;;  %v27_v18 = vld [vmem:[%s313_s1 + $0x28] sm:$0xff]  ;;  %v26_v20 = vld [vmem:[%s313_s1 + $0x20] sm:$0xff] }
   0x7   :  { %156 = vmatpush.msra.mxu3 %v35_v2  ;;  %147 = vmatmul.msk.f32.vlgmr.msra.gmra.mxu1 %vm64_vm0, %v15_v7  ;;  %v43_v17 = vld [vmem:[%s315_s2 + $0x18] sm:$0xff]  ;;  %v41_v19 = vld [vmem:[%s315_s2 + $0x8] sm:$0xff]  ;;  %v24_v23 = vld [vmem:[%s313_s1 + $0x10] sm:$0xff] }
   0x8   :  { %80 = vmatpush.msra.mxu0 %v34_v5  ;;  %157 = vmatpush.msra.mxu2 %v34_v5  ;;  %v19_v21 = vld [vmem:[%s314_s0 + $0x28] sm:$0xff]  ;;  %v25_v22 = vld [vmem:[%s313_s1 + $0x18] sm:$0xff]  ;;  %v22_v25 = vld [vmem:[%s313_s1] sm:$0xff] }
   0x9   :  { %158 = vmatpush.msra.mxu3 %v34_v5  ;;  %56 = vperm.xlu1 %185, %v42_v10   ;;  %v23_v24 = vld [vmem:[%s313_s1 + $0x8] sm:$0xff]  ;;  %v14_v26 = vld [vmem:[%s314_s0] sm:$0xff]  ;;  %v16_v27 = vld [vmem:[%s314_s0 + $0x10] sm:$0xff] }
   0xa   :  { %81 = vmatpush.msra.mxu0 %v33_v8  ;;  %159 = vmatpush.msra.mxu2 %v33_v8  ;;  %v18_v28 = vld [vmem:[%s314_s0 + $0x20] sm:$0xff]  ;;  %v21_v29 = vld [vmem:[%s314_s0 + $0x38] sm:$0xff]  ;;  %v20_v30 = vld [vmem:[%s314_s0 + $0x30] sm:$0xff] }
   0xb   :  { %160 = vmatpush.msra.mxu3 %v33_v8  ;;  %46 = vperm.xlu0 %184, %v40_v12  }
   0xc   :  { %82 = vmatpush.msra.mxu0 %v32_v9  ;;  %161 = vmatpush.msra.mxu2 %v32_v9 }
   0xd   :  { %162 = vmatpush.msra.mxu3 %v32_v9 }
   0xe   :  { %83 = vmatpush.msra.mxu0 %v31_v11  ;;  %163 = vmatpush.msra.mxu2 %v31_v11 }
   0xf   :  { %164 = vmatpush.msra.mxu3 %v31_v11  ;;  %148 = vmatmul.msk.f32.gmra.mxu1 %vm64_vm0, %v17_v14 }
  0x10   :  { %84 = vmatpush.msra.mxu0 %v30_v13  ;;  %165 = vmatpush.msra.mxu2 %v30_v13 }
  0x11   :  { %166 = vmatpush.msra.mxu3 %v30_v13  ;;  %61 = vperm.xlu1 %185, %v43_v17  }
  0x12   :  { %85 = vmatpush.msra.mxu0 %v29_v15  ;;  %167 = vmatpush.msra.mxu2 %v29_v15 }
  0x13   :  { %168 = vmatpush.msra.mxu3 %v29_v15  ;;  %51 = vperm.xlu0 %184, %v41_v19  }
  0x14   :  { %86 = vmatpush.msra.mxu0 %v28_v16  ;;  %169 = vmatpush.msra.mxu2 %v28_v16 }
  0x15   :  { %170 = vmatpush.msra.mxu3 %v28_v16 }
  0x16   :  { %87 = vmatpush.msra.mxu0 %v27_v18  ;;  %171 = vmatpush.msra.mxu2 %v27_v18 }
  0x17   :  { %172 = vmatpush.msra.mxu3 %v27_v18  ;;  %149 = vmatmul.msk.f32.gmra.mxu1 %vm64_vm0, %v19_v21 }
  0x18   :  { %88 = vmatpush.msra.mxu0 %v26_v20  ;;  %173 = vmatpush.msra.mxu2 %v26_v20 }
  0x19   :  { %174 = vmatpush.msra.mxu3 %v26_v20 }
  0x1a   :  { %89 = vmatpush.msra.mxu0 %v25_v22  ;;  %175 = vmatpush.msra.mxu2 %v25_v22 }
  0x1b   :  { %176 = vmatpush.msra.mxu3 %v25_v22 }
  0x1c   :  { %90 = vmatpush.msra.mxu0 %v24_v23  ;;  %177 = vmatpush.msra.mxu2 %v24_v23 }
  0x1d   :  { %178 = vmatpush.msra.mxu3 %v24_v23 }
  0x1e   :  { %91 = vmatpush.msra.mxu0 %v23_v24  ;;  %179 = vmatpush.msra.mxu2 %v23_v24 }
  0x1f   :  { %180 = vmatpush.msra.mxu3 %v23_v24  ;;  %150 = vmatmul.msk.f32.gmra.mxu1 %vm64_vm0, %v21_v29 }
  0x20   :  { %92 = vmatpush.msra.mxu0 %v22_v25  ;;  %181 = vmatpush.msra.mxu2 %v22_v25 }
  0x21   :  { %182 = vmatpush.msra.mxu3 %v22_v25  ;;  %93 = vmatmul.f32.vlgmr.msra.gmra.mxu0 %v14_v26 }
  0x22   :  { %96 = vmatmul.f32.vlgmr.msra.gmra.mxu2 %v16_v27  ;;  %99 = vmatmul.f32.vlgmr.msra.gmra.mxu3 %v18_v28 }
  0x2a   :  { %102 = vmatmul.f32.gmra.mxu3 %v20_v30 }
  0x7b   :  { %v57_v37 = vpop.permute.xlu1 %56 }
  0x7d   :  { %v47_v32 = vpop.permute.xlu0 %46 }
  0x83   :  { %v62_v49 = vpop.permute.xlu1 %61 }
  0x84   :  { %v123_v31 = vpop.f32.mrf.mxu1 }
  0x85   :  { %v52_v39 = vpop.permute.xlu0 %51 }
  0x8c   :  { %v126_v33 = vpop.f32.mrf.mxu1 }
  0x94   :  { %v129_v40 = vpop.f32.mrf.mxu1 }
  0x9c   :  { %v132_v51 = vpop.f32.mrf.mxu1 }
  0x9e   :  { %v94_v34 = vpop.f32.mrf.mxu0 }
  0x9f   :  { %v95_v35 = vadd.f32 %v94_v34, %v47_v32 }
  0xa1   :  { %v124_v36 = vadd.f32 %v123_v31, %v95_v35 }
  0xa3   :  { %v135_v38 = vmax.f32 %v124_v36, 0.0 }
  0xa5   :  { %139 = vst [vmem:[%s316_s3] sm:$0xff] %v135_v38  ;;  %v97_v41 = vpop.f32.mrf.mxu2  ;;  %v100_v42 = vpop.f32.mrf.mxu3 }
  0xa6   :  { %v98_v43 = vadd.f32 %v97_v41, %v52_v39  ;;  %v101_v44 = vadd.f32 %v100_v42, %v57_v37 }
  0xa8   :  { %v127_v45 = vadd.f32 %v126_v33, %v98_v43  ;;  %v130_v46 = vadd.f32 %v129_v40, %v101_v44 }
  0xaa   :  { %v136_v47 = vmax.f32 %v127_v45, 0.0  ;;  %v137_v48 = vmax.f32 %v130_v46, 0.0 }
  0xac   :  { %140 = vst [vmem:[%s316_s3 + $0x8] sm:$0xff] %v136_v47 }
  0xad   :  { %141 = vst [vmem:[%s316_s3 + $0x10] sm:$0xff] %v137_v48  ;;  %v103_v50 = vpop.f32.mrf.mxu3 }
  0xae   :  { %v104_v52 = vadd.f32 %v103_v50, %v62_v49 }
  0xb0   :  { %v133_v53 = vadd.f32 %v132_v51, %v104_v52 }
  0xb2   :  { %v138_v54 = vmax.f32 %v133_v53, 0.0 }
  0xb4   :  { %142 = vst [vmem:[%s316_s3 + $0x18] sm:$0xff] %v138_v54 }

// kernel: _lambda_.14
= control target key start
LH: loop header
LB: loop body
LE: loop exit
PB: predicated region body
PF: predicated region fallthrough
CT: control target
= control target key end

     0   :  { %v72_v0 = vmov 0   ;;  %vm30_vm0 = vcmask 130048   ;;  %s117_s2 = inlined_call_operand.vmem [shape: f32[16,1], index: 2, kind: input, shape index: {}]   ;;  %s118_s1 = inlined_call_operand.vmem [shape: f32[16,128], index: 1, kind: input, shape index: {}]   ;;  %s119_s0 = inlined_call_operand.vmem [shape: f32[16,16], index: 0, kind: input, shape index: {}]   ;;  %s120_s3 = inlined_call_operand.vmem [shape: f32[16,128], index: 3, kind: output, shape index: {}]  }
   0x1   :  { %71 = vset.pattern.permute.xlu0 %v72_v0  ;;  %v18_v1 = vld [vmem:[%s117_s2] sm:$0xff]  ;;  %v17_v2 = vld [vmem:[%s118_s1 + $0x8] sm:$0xff] }
   0x2   :  { %v16_v3 = vld [vmem:[%s118_s1] sm:$0xff]  ;;  %22 = vperm.xlu0 %71, %v18_v1   ;;  %51 = vmatpush.msra.mxu0 %v17_v2  ;;  %v15_v5 = vld [vmem:[%s119_s0 + $0x8] sm:$0xff] }
   0x3   :  { %v14_v4 = vld [vmem:[%s119_s0] sm:$0xff]  ;;  %68 = vmatpush.msra.mxu1 %v17_v2  ;;  %v19_v6 = vld [vmem:[%s117_s2 + $0x8] sm:$0xff] }
   0x4   :  { %52 = vmatpush.msra.mxu0 %v16_v3 }
   0x5   :  { %69 = vmatpush.msra.mxu1 %v16_v3  ;;  %66 = vmatmul.msk.f32.vlgmr.msra.gmra.mxu0 %vm30_vm0, %v14_v4 }
   0x6   :  { %67 = vmatmul.msk.f32.vlgmr.msra.gmra.mxu1 %vm30_vm0, %v15_v5 }
   0xa   :  { %27 = vperm.xlu0 %71, %v19_v6  }
  0x74   :  { %v23_v7 = vpop.permute.xlu0 %22 }
  0x7c   :  { %v28_v9 = vpop.permute.xlu0 %27 }
  0x82   :  { %v54_v8 = vpop.f32.mrf.mxu0 }
  0x83   :  { %v55_v10 = vadd.f32 %v54_v8, %v23_v7  ;;  %v57_v11 = vpop.f32.mrf.mxu1 }
  0x84   :  { %v58_v12 = vadd.f32 %v57_v11, %v28_v9 }
  0x85   :  { %60 = vst [vmem:[%s120_s3] sm:$0xff] %v55_v10 }
  0x86   :  { %61 = vst [vmem:[%s120_s3 + $0x8] sm:$0xff] %v58_v12 }

// kernel: _lambda_.15
= control target key start
LH: loop header
LB: loop body
LE: loop exit
PB: predicated region body
PF: predicated region fallthrough
CT: control target
= control target key end

     0   :  { %vm24_vm0 = vcmask 130048   ;;  %s146_s1 = inlined_call_operand.vmem [shape: f32[16,128], index: 1, kind: input, shape index: {}]   ;;  %s147_s0 = inlined_call_operand.vmem [shape: f32[32,16], index: 0, kind: input, shape index: {}]   ;;  %s148_s2 = inlined_call_operand.vmem [shape: f32[32,128], index: 2, kind: input, shape index: {}]   ;;  %s149_s3 = inlined_call_operand.vmem [shape: f32[32,128], index: 3, kind: output, shape index: {}]  }
   0x1   :  { %v19_v0 = vld [vmem:[%s146_s1 + $0x8] sm:$0xff]  ;;  %v18_v1 = vld [vmem:[%s146_s1] sm:$0xff]  ;;  %v16_v2 = vld [vmem:[%s147_s0 + $0x10] sm:$0xff] }
   0x2   :  { %79 = vmatpush.msra.mxu2 %v19_v0  ;;  %80 = vmatpush.msra.mxu3 %v19_v0  ;;  %v17_v3 = vld [vmem:[%s147_s0 + $0x18] sm:$0xff]  ;;  %v14_v4 = vld [vmem:[%s147_s0] sm:$0xff]  ;;  %v15_v5 = vld [vmem:[%s147_s0 + $0x8] sm:$0xff] }
   0x3   :  { %51 = vmatpush.msra.mxu0 %v19_v0  ;;  %78 = vmatpush.msra.mxu1 %v19_v0  ;;  %v20_v6 = vld [vmem:[%s148_s2] sm:$0xff]  ;;  %v21_v7 = vld [vmem:[%s148_s2 + $0x8] sm:$0xff]  ;;  %v22_v12 = vld [vmem:[%s148_s2 + $0x10] sm:$0xff] }
   0x4   :  { %82 = vmatpush.msra.mxu2 %v18_v1  ;;  %83 = vmatpush.msra.mxu3 %v18_v1  ;;  %v23_v13 = vld [vmem:[%s148_s2 + $0x18] sm:$0xff] }
   0x5   :  { %76 = vmatmul.msk.f32.vlgmr.msra.gmra.mxu2 %vm24_vm0, %v16_v2  ;;  %77 = vmatmul.msk.f32.vlgmr.msra.gmra.mxu3 %vm24_vm0, %v17_v3 }
   0x6   :  { %52 = vmatpush.msra.mxu0 %v18_v1  ;;  %81 = vmatpush.msra.mxu1 %v18_v1 }
   0x7   :  { %74 = vmatmul.msk.f32.vlgmr.msra.gmra.mxu0 %vm24_vm0, %v14_v4  ;;  %75 = vmatmul.msk.f32.vlgmr.msra.gmra.mxu1 %vm24_vm0, %v15_v5 }
  0x84   :  { %v54_v8 = vpop.f32.mrf.mxu0  ;;  %v57_v9 = vpop.f32.mrf.mxu1 }
  0x85   :  { %v55_v10 = vadd.f32 %v54_v8, %v20_v6  ;;  %v58_v11 = vadd.f32 %v57_v9, %v21_v7 }
  0x87   :  { %66 = vst [vmem:[%s149_s3] sm:$0xff] %v55_v10 }
  0x88   :  { %67 = vst [vmem:[%s149_s3 + $0x8] sm:$0xff] %v58_v11  ;;  %v60_v14 = vpop.f32.mrf.mxu2  ;;  %v63_v15 = vpop.f32.mrf.mxu3 }
  0x89   :  { %v61_v16 = vadd.f32 %v60_v14, %v22_v12  ;;  %v64_v17 = vadd.f32 %v63_v15, %v23_v13 }
  0x8b   :  { %68 = vst [vmem:[%s149_s3 + $0x10] sm:$0xff] %v61_v16 }
  0x8c   :  { %69 = vst [vmem:[%s149_s3 + $0x18] sm:$0xff] %v64_v17 }

// kernel: _lambda_.16
= control target key start
LH: loop header
LB: loop body
LE: loop exit
PB: predicated region body
PF: predicated region fallthrough
CT: control target
= control target key end

     0   :  { %v127_v2 = vmov 0   ;;  %vm48_vm0 = vcmask 130048   ;;  %s228_s1 = inlined_call_operand.vmem [shape: f32[144,128], index: 1, kind: input, shape index: {}]   ;;  %s229_s0 = inlined_call_operand.vmem [shape: f32[16,144], index: 0, kind: input, shape index: {}]   ;;  %s230_s2 = inlined_call_operand.vmem [shape: f32[16,1], index: 2, kind: input, shape index: {}]   ;;  %s231_s3 = inlined_call_operand.vmem [shape: f32[16,128], index: 3, kind: output, shape index: {}]  }
   0x1   :  { %v33_v0 = vld [vmem:[%s228_s1 + $0x78] sm:$0xff]  ;;  %v32_v1 = vld [vmem:[%s228_s1 + $0x70] sm:$0xff]  ;;  %126 = vset.pattern.permute.xlu0 %v127_v2  ;;  %v31_v3 = vld [vmem:[%s228_s1 + $0x68] sm:$0xff] }
   0x2   :  { %55 = vmatpush.msra.mxu0 %v33_v0  ;;  %109 = vmatpush.msra.mxu2 %v33_v0  ;;  %v30_v4 = vld [vmem:[%s228_s1 + $0x60] sm:$0xff]  ;;  %v35_v5 = vld [vmem:[%s228_s1 + $0x88] sm:$0xff]  ;;  %v29_v7 = vld [vmem:[%s228_s1 + $0x58] sm:$0xff] }
   0x3   :  { %v34_v6 = vld [vmem:[%s228_s1 + $0x80] sm:$0xff]  ;;  %92 = vmatpush.msra.mxu1 %v35_v5  ;;  %v15_v8 = vld [vmem:[%s229_s0 + $0x8] sm:$0xff]  ;;  %v28_v10 = vld [vmem:[%s228_s1 + $0x50] sm:$0xff] }
   0x4   :  { %56 = vmatpush.msra.mxu0 %v32_v1  ;;  %110 = vmatpush.msra.mxu2 %v32_v1  ;;  %v36_v9 = vld [vmem:[%s230_s2] sm:$0xff]  ;;  %v27_v11 = vld [vmem:[%s228_s1 + $0x48] sm:$0xff]  ;;  %v25_v14 = vld [vmem:[%s228_s1 + $0x38] sm:$0xff] }
   0x5   :  { %93 = vmatpush.msra.mxu1 %v34_v6  ;;  %40 = vperm.xlu0 %126, %v36_v9   ;;  %v26_v12 = vld [vmem:[%s228_s1 + $0x40] sm:$0xff]  ;;  %v37_v13 = vld [vmem:[%s230_s2 + $0x8] sm:$0xff]  ;;  %v17_v15 = vld [vmem:[%s229_s0 + $0x18] sm:$0xff] }
   0x6   :  { %57 = vmatpush.msra.mxu0 %v31_v3  ;;  %111 = vmatpush.msra.mxu2 %v31_v3  ;;  %v24_v16 = vld [vmem:[%s228_s1 + $0x30] sm:$0xff]  ;;  %v23_v17 = vld [vmem:[%s228_s1 + $0x28] sm:$0xff]  ;;  %v22_v18 = vld [vmem:[%s228_s1 + $0x20] sm:$0xff] }
   0x7   :  { %107 = vmatmul.msk.f32.vlgmr.msra.gmra.mxu1 %vm48_vm0, %v15_v8  ;;  %v21_v19 = vld [vmem:[%s228_s1 + $0x18] sm:$0xff]  ;;  %v20_v20 = vld [vmem:[%s228_s1 + $0x10] sm:$0xff]  ;;  %v19_v21 = vld [vmem:[%s228_s1 + $0x8] sm:$0xff] }
   0x8   :  { %58 = vmatpush.msra.mxu0 %v30_v4  ;;  %112 = vmatpush.msra.mxu2 %v30_v4  ;;  %v18_v22 = vld [vmem:[%s228_s1] sm:$0xff]  ;;  %v16_v24 = vld [vmem:[%s229_s0 + $0x10] sm:$0xff] }
   0x9   :  { %v14_v23 = vld [vmem:[%s229_s0] sm:$0xff] }
   0xa   :  { %59 = vmatpush.msra.mxu0 %v29_v7  ;;  %113 = vmatpush.msra.mxu2 %v29_v7 }
   0xc   :  { %60 = vmatpush.msra.mxu0 %v28_v10  ;;  %114 = vmatpush.msra.mxu2 %v28_v10 }
   0xd   :  { %45 = vperm.xlu0 %126, %v37_v13  }
   0xe   :  { %61 = vmatpush.msra.mxu0 %v27_v11  ;;  %115 = vmatpush.msra.mxu2 %v27_v11 }
   0xf   :  { %108 = vmatmul.msk.f32.gmra.mxu1 %vm48_vm0, %v17_v15 }
  0x10   :  { %62 = vmatpush.msra.mxu0 %v26_v12  ;;  %116 = vmatpush.msra.mxu2 %v26_v12 }
  0x12   :  { %63 = vmatpush.msra.mxu0 %v25_v14  ;;  %117 = vmatpush.msra.mxu2 %v25_v14 }
  0x14   :  { %64 = vmatpush.msra.mxu0 %v24_v16  ;;  %118 = vmatpush.msra.mxu2 %v24_v16 }
  0x16   :  { %65 = vmatpush.msra.mxu0 %v23_v17  ;;  %119 = vmatpush.msra.mxu2 %v23_v17 }
  0x18   :  { %66 = vmatpush.msra.mxu0 %v22_v18  ;;  %120 = vmatpush.msra.mxu2 %v22_v18 }
  0x1a   :  { %67 = vmatpush.msra.mxu0 %v21_v19  ;;  %121 = vmatpush.msra.mxu2 %v21_v19 }
  0x1c   :  { %68 = vmatpush.msra.mxu0 %v20_v20  ;;  %122 = vmatpush.msra.mxu2 %v20_v20 }
  0x1e   :  { %69 = vmatpush.msra.mxu0 %v19_v21  ;;  %123 = vmatpush.msra.mxu2 %v19_v21 }
  0x20   :  { %70 = vmatpush.msra.mxu0 %v18_v22  ;;  %124 = vmatpush.msra.mxu2 %v18_v22 }
  0x21   :  { %71 = vmatmul.f32.vlgmr.msra.gmra.mxu0 %v14_v23  ;;  %74 = vmatmul.f32.vlgmr.msra.gmra.mxu2 %v16_v24 }
  0x77   :  { %v41_v25 = vpop.permute.xlu0 %40 }
  0x7f   :  { %v46_v30 = vpop.permute.xlu0 %45 }
  0x84   :  { %v95_v26 = vpop.f32.mrf.mxu1 }
  0x8c   :  { %v98_v32 = vpop.f32.mrf.mxu1 }
  0x9e   :  { %v72_v27 = vpop.f32.mrf.mxu0 }
  0x9f   :  { %v73_v28 = vadd.f32 %v72_v27, %v41_v25 }
  0xa1   :  { %v96_v29 = vadd.f32 %v95_v26, %v73_v28 }
  0xa3   :  { %101 = vst [vmem:[%s231_s3] sm:$0xff] %v96_v29 }
  0xa4   :  { %v75_v31 = vpop.f32.mrf.mxu2 }
  0xa5   :  { %v76_v33 = vadd.f32 %v75_v31, %v46_v30 }
  0xa7   :  { %v99_v34 = vadd.f32 %v98_v32, %v76_v33 }
  0xa9   :  { %102 = vst [vmem:[%s231_s3 + $0x8] sm:$0xff] %v99_v34 }

// kernel: _lambda_.17
= control target key start
LH: loop header
LB: loop body
LE: loop exit
PB: predicated region body
PF: predicated region fallthrough
CT: control target
= control target key end

     0   :  { %v170_v5 = vmov 0   ;;  %vm68_vm0 = vcmask 261120   ;;  %s331_s1 = inlined_call_operand.vmem [shape: f32[288,128], index: 1, kind: input, shape index: {}]   ;;  %s332_s0 = inlined_call_operand.vmem [shape: f32[16,288], index: 0, kind: input, shape index: {}]   ;;  %s333_s2 = inlined_call_operand.vmem [shape: f32[16,1], index: 2, kind: input, shape index: {}]   ;;  %s334_s3 = inlined_call_operand.vmem [shape: f32[16,128], index: 3, kind: output, shape index: {}]  }
   0x1   :  { %v35_v0 = vld [vmem:[%s331_s1 + $0x78] sm:$0xff]  ;;  %v34_v2 = vld [vmem:[%s331_s1 + $0x70] sm:$0xff]  ;;  %v33_v4 = vld [vmem:[%s331_s1 + $0x68] sm:$0xff]  ;;  %169 = vset.pattern.permute.xlu0 %v170_v5 }
   0x2   :  { %v51_v1 = vld [vmem:[%s331_s1 + $0xf8] sm:$0xff]  ;;  %75 = vmatpush.msra.mxu0 %v35_v0  ;;  %152 = vmatpush.msra.mxu3 %v35_v0  ;;  %v50_v3 = vld [vmem:[%s331_s1 + $0xf0] sm:$0xff]  ;;  %v49_v6 = vld [vmem:[%s331_s1 + $0xe8] sm:$0xff] }
   0x3   :  { %98 = vmatpush.msra.mxu1 %v51_v1  ;;  %v32_v7 = vld [vmem:[%s331_s1 + $0x60] sm:$0xff]  ;;  %v31_v9 = vld [vmem:[%s331_s1 + $0x58] sm:$0xff]  ;;  %v30_v12 = vld [vmem:[%s331_s1 + $0x50] sm:$0xff] }
   0x4   :  { %76 = vmatpush.msra.mxu0 %v34_v2  ;;  %153 = vmatpush.msra.mxu3 %v34_v2  ;;  %v48_v8 = vld [vmem:[%s331_s1 + $0xe0] sm:$0xff]  ;;  %v47_v10 = vld [vmem:[%s331_s1 + $0xd8] sm:$0xff]  ;;  %v54_v13 = vld [vmem:[%s331_s1 + $0x110] sm:$0xff] }
   0x5   :  { %99 = vmatpush.msra.mxu1 %v50_v3  ;;  %v55_v11 = vld [vmem:[%s331_s1 + $0x118] sm:$0xff]  ;;  %v46_v14 = vld [vmem:[%s331_s1 + $0xd0] sm:$0xff]  ;;  %v53_v15 = vld [vmem:[%s331_s1 + $0x108] sm:$0xff] }
   0x6   :  { %77 = vmatpush.msra.mxu0 %v33_v4  ;;  %154 = vmatpush.msra.mxu3 %v33_v4  ;;  %v29_v16 = vld [vmem:[%s331_s1 + $0x48] sm:$0xff]  ;;  %v52_v18 = vld [vmem:[%s331_s1 + $0x100] sm:$0xff]  ;;  %v16_v21 = vld [vmem:[%s332_s0 + $0x10] sm:$0xff] }
   0x7   :  { %100 = vmatpush.msra.mxu1 %v49_v6  ;;  %133 = vmatpush.msra.mxu2 %v55_v11  ;;  %v45_v17 = vld [vmem:[%s331_s1 + $0xc8] sm:$0xff]  ;;  %v28_v19 = vld [vmem:[%s331_s1 + $0x40] sm:$0xff]  ;;  %v27_v22 = vld [vmem:[%s331_s1 + $0x38] sm:$0xff] }
   0x8   :  { %78 = vmatpush.msra.mxu0 %v32_v7  ;;  %155 = vmatpush.msra.mxu3 %v32_v7  ;;  %v44_v20 = vld [vmem:[%s331_s1 + $0xc0] sm:$0xff]  ;;  %v43_v23 = vld [vmem:[%s331_s1 + $0xb8] sm:$0xff]  ;;  %v26_v25 = vld [vmem:[%s331_s1 + $0x30] sm:$0xff] }
   0x9   :  { %101 = vmatpush.msra.mxu1 %v48_v8  ;;  %134 = vmatpush.msra.mxu2 %v54_v13  ;;  %v56_v24 = vld [vmem:[%s333_s2] sm:$0xff]  ;;  %v42_v26 = vld [vmem:[%s331_s1 + $0xb0] sm:$0xff]  ;;  %v25_v27 = vld [vmem:[%s331_s1 + $0x28] sm:$0xff] }
   0xa   :  { %79 = vmatpush.msra.mxu0 %v31_v9  ;;  %156 = vmatpush.msra.mxu3 %v31_v9  ;;  %v41_v28 = vld [vmem:[%s331_s1 + $0xa8] sm:$0xff]  ;;  %v24_v29 = vld [vmem:[%s331_s1 + $0x20] sm:$0xff]  ;;  %v23_v32 = vld [vmem:[%s331_s1 + $0x18] sm:$0xff] }
   0xb   :  { %102 = vmatpush.msra.mxu1 %v47_v10  ;;  %135 = vmatpush.msra.mxu2 %v53_v15  ;;  %v40_v30 = vld [vmem:[%s331_s1 + $0xa0] sm:$0xff]  ;;  %v19_v31 = vld [vmem:[%s332_s0 + $0x28] sm:$0xff]  ;;  %v39_v33 = vld [vmem:[%s331_s1 + $0x98] sm:$0xff] }
   0xc   :  { %80 = vmatpush.msra.mxu0 %v30_v12  ;;  %157 = vmatpush.msra.mxu3 %v30_v12  ;;  %v57_v34 = vld [vmem:[%s333_s2 + $0x8] sm:$0xff]  ;;  %v22_v35 = vld [vmem:[%s331_s1 + $0x10] sm:$0xff]  ;;  %v20_v39 = vld [vmem:[%s331_s1] sm:$0xff] }
   0xd   :  { %103 = vmatpush.msra.mxu1 %v46_v14  ;;  %136 = vmatpush.msra.mxu2 %v52_v18  ;;  %v38_v36 = vld [vmem:[%s331_s1 + $0x90] sm:$0xff]  ;;  %v21_v37 = vld [vmem:[%s331_s1 + $0x8] sm:$0xff]  ;;  %v36_v40 = vld [vmem:[%s331_s1 + $0x80] sm:$0xff] }
   0xe   :  { %81 = vmatpush.msra.mxu0 %v29_v16  ;;  %158 = vmatpush.msra.mxu3 %v29_v16  ;;  %v37_v38 = vld [vmem:[%s331_s1 + $0x88] sm:$0xff]  ;;  %v14_v41 = vld [vmem:[%s332_s0] sm:$0xff]  ;;  %v17_v42 = vld [vmem:[%s332_s0 + $0x18] sm:$0xff] }
   0xf   :  { %104 = vmatpush.msra.mxu1 %v45_v17  ;;  %150 = vmatmul.msk.f32.vlgmr.msra.gmra.mxu2 %vm68_vm0, %v16_v21  ;;  %v15_v43 = vld [vmem:[%s332_s0 + $0x8] sm:$0xff]  ;;  %v18_v44 = vld [vmem:[%s332_s0 + $0x20] sm:$0xff] }
  0x10   :  { %82 = vmatpush.msra.mxu0 %v28_v19  ;;  %159 = vmatpush.msra.mxu3 %v28_v19 }
  0x11   :  { %105 = vmatpush.msra.mxu1 %v44_v20  ;;  %60 = vperm.xlu0 %169, %v56_v24  }
  0x12   :  { %83 = vmatpush.msra.mxu0 %v27_v22  ;;  %160 = vmatpush.msra.mxu3 %v27_v22 }
  0x13   :  { %106 = vmatpush.msra.mxu1 %v43_v23 }
  0x14   :  { %84 = vmatpush.msra.mxu0 %v26_v25  ;;  %161 = vmatpush.msra.mxu3 %v26_v25 }
  0x15   :  { %107 = vmatpush.msra.mxu1 %v42_v26 }
  0x16   :  { %85 = vmatpush.msra.mxu0 %v25_v27  ;;  %162 = vmatpush.msra.mxu3 %v25_v27 }
  0x17   :  { %108 = vmatpush.msra.mxu1 %v41_v28  ;;  %151 = vmatmul.msk.f32.gmra.mxu2 %vm68_vm0, %v19_v31 }
  0x18   :  { %86 = vmatpush.msra.mxu0 %v24_v29  ;;  %163 = vmatpush.msra.mxu3 %v24_v29 }
  0x19   :  { %109 = vmatpush.msra.mxu1 %v40_v30  ;;  %65 = vperm.xlu0 %169, %v57_v34  }
  0x1a   :  { %87 = vmatpush.msra.mxu0 %v23_v32  ;;  %164 = vmatpush.msra.mxu3 %v23_v32 }
  0x1b   :  { %110 = vmatpush.msra.mxu1 %v39_v33 }
  0x1c   :  { %88 = vmatpush.msra.mxu0 %v22_v35  ;;  %165 = vmatpush.msra.mxu3 %v22_v35 }
  0x1d   :  { %111 = vmatpush.msra.mxu1 %v38_v36 }
  0x1e   :  { %89 = vmatpush.msra.mxu0 %v21_v37  ;;  %166 = vmatpush.msra.mxu3 %v21_v37 }
  0x1f   :  { %112 = vmatpush.msra.mxu1 %v37_v38 }
  0x20   :  { %90 = vmatpush.msra.mxu0 %v20_v39  ;;  %167 = vmatpush.msra.mxu3 %v20_v39 }
  0x21   :  { %113 = vmatpush.msra.mxu1 %v36_v40  ;;  %91 = vmatmul.f32.vlgmr.msra.gmra.mxu0 %v14_v41 }
  0x22   :  { %94 = vmatmul.f32.vlgmr.msra.gmra.mxu3 %v17_v42  ;;  %114 = vmatmul.f32.vlgmr.msra.gmra.mxu1 %v15_v43 }
  0x2a   :  { %117 = vmatmul.f32.gmra.mxu1 %v18_v44 }
  0x83   :  { %v61_v45 = vpop.permute.xlu0 %60 }
  0x8b   :  { %v66_v52 = vpop.permute.xlu0 %65 }
  0x92   :  { %v138_v46 = vpop.f32.mrf.mxu2 }
  0x9a   :  { %v141_v56 = vpop.f32.mrf.mxu2 }
  0x9e   :  { %v92_v47 = vpop.f32.mrf.mxu0 }
  0x9f   :  { %v93_v48 = vadd.f32 %v92_v47, %v61_v45  ;;  %v115_v49 = vpop.f32.mrf.mxu1 }
  0xa1   :  { %v116_v50 = vadd.f32 %v115_v49, %v93_v48 }
  0xa3   :  { %v139_v51 = vadd.f32 %v138_v46, %v116_v50 }
  0xa5   :  { %144 = vst [vmem:[%s334_s3] sm:$0xff] %v139_v51  ;;  %v95_v53 = vpop.f32.mrf.mxu3 }
  0xa6   :  { %v96_v54 = vadd.f32 %v95_v53, %v66_v52 }
  0xa7   :  { %v118_v55 = vpop.f32.mrf.mxu1 }
  0xa8   :  { %v119_v57 = vadd.f32 %v118_v55, %v96_v54 }
  0xaa   :  { %v142_v58 = vadd.f32 %v141_v56, %v119_v57 }
  0xac   :  { %145 = vst [vmem:[%s334_s3 + $0x8] sm:$0xff] %v142_v58 }

// kernel: _lambda_.18
= control target key start
LH: loop header
LB: loop body
LE: loop exit
PB: predicated region body
PF: predicated region fallthrough
CT: control target
= control target key end

     0   :  { %v242_v15 = vmov 0   ;;  %vm82_vm0 = vcmask 130048   ;;  %s439_s1 = inlined_call_operand.vmem [shape: f32[144,256], index: 1, kind: input, shape index: {}]   ;;  %s440_s0 = inlined_call_operand.vmem [shape: f32[32,144], index: 0, kind: input, shape index: {}]   ;;  %s441_s2 = inlined_call_operand.vmem [shape: f32[32,1], index: 2, kind: input, shape index: {}]   ;;  %s442_s3 = inlined_call_operand.vmem [shape: f32[32,256], index: 3, kind: output, shape index: {}]  }
   0x1   :  { %v52_v0 = vld [vmem:[%s439_s1 + $0xf0] sm:$0xff]  ;;  %v53_v1 = vld [vmem:[%s439_s1 + $0xf8] sm:$0xff]  ;;  %v50_v2 = vld [vmem:[%s439_s1 + $0xe0] sm:$0xff]  ;;  %240 = vset.pattern.permute.xlu0 %v242_v15  ;;  %241 = vset.pattern.permute.xlu1 %v242_v15 }
   0x2   :  { %95 = vmatpush.msra.mxu0 %v52_v0  ;;  %153 = vmatpush.msra.mxu2 %v53_v1  ;;  %v51_v3 = vld [vmem:[%s439_s1 + $0xe8] sm:$0xff]  ;;  %v48_v4 = vld [vmem:[%s439_s1 + $0xd0] sm:$0xff]  ;;  %v49_v5 = vld [vmem:[%s439_s1 + $0xd8] sm:$0xff] }
   0x3   :  { %v46_v6 = vld [vmem:[%s439_s1 + $0xc0] sm:$0xff]  ;;  %v47_v7 = vld [vmem:[%s439_s1 + $0xc8] sm:$0xff]  ;;  %v44_v8 = vld [vmem:[%s439_s1 + $0xb0] sm:$0xff] }
   0x4   :  { %96 = vmatpush.msra.mxu0 %v50_v2  ;;  %154 = vmatpush.msra.mxu2 %v51_v3  ;;  %v45_v9 = vld [vmem:[%s439_s1 + $0xb8] sm:$0xff]  ;;  %v42_v10 = vld [vmem:[%s439_s1 + $0xa0] sm:$0xff]  ;;  %v43_v11 = vld [vmem:[%s439_s1 + $0xa8] sm:$0xff] }
   0x5   :  { %v40_v12 = vld [vmem:[%s439_s1 + $0x90] sm:$0xff]  ;;  %v41_v13 = vld [vmem:[%s439_s1 + $0x98] sm:$0xff]  ;;  %v54_v17 = vld [vmem:[%s439_s1 + $0x100] sm:$0xff] }
   0x6   :  { %97 = vmatpush.msra.mxu0 %v48_v4  ;;  %155 = vmatpush.msra.mxu2 %v49_v5  ;;  %v56_v14 = vld [vmem:[%s439_s1 + $0x110] sm:$0xff]  ;;  %v57_v16 = vld [vmem:[%s439_s1 + $0x118] sm:$0xff]  ;;  %v38_v18 = vld [vmem:[%s439_s1 + $0x80] sm:$0xff] }
   0x7   :  { %v39_v19 = vld [vmem:[%s439_s1 + $0x88] sm:$0xff]  ;;  %138 = vmatpush.msra.mxu1 %v56_v14  ;;  %196 = vmatpush.msra.mxu3 %v57_v16  ;;  %v36_v22 = vld [vmem:[%s439_s1 + $0x70] sm:$0xff]  ;;  %v37_v23 = vld [vmem:[%s439_s1 + $0x78] sm:$0xff] }
   0x8   :  { %98 = vmatpush.msra.mxu0 %v46_v6  ;;  %156 = vmatpush.msra.mxu2 %v47_v7  ;;  %v55_v20 = vld [vmem:[%s439_s1 + $0x108] sm:$0xff]  ;;  %v34_v24 = vld [vmem:[%s439_s1 + $0x60] sm:$0xff]  ;;  %v32_v27 = vld [vmem:[%s439_s1 + $0x50] sm:$0xff] }
   0x9   :  { %v15_v21 = vld [vmem:[%s440_s0 + $0x8] sm:$0xff]  ;;  %139 = vmatpush.msra.mxu1 %v54_v17  ;;  %197 = vmatpush.msra.mxu3 %v55_v20  ;;  %v58_v26 = vld [vmem:[%s441_s2] sm:$0xff]  ;;  %v33_v28 = vld [vmem:[%s439_s1 + $0x58] sm:$0xff] }
   0xa   :  { %99 = vmatpush.msra.mxu0 %v44_v8  ;;  %157 = vmatpush.msra.mxu2 %v45_v9  ;;  %v35_v25 = vld [vmem:[%s439_s1 + $0x68] sm:$0xff]  ;;  %v30_v29 = vld [vmem:[%s439_s1 + $0x40] sm:$0xff]  ;;  %v17_v31 = vld [vmem:[%s440_s0 + $0x18] sm:$0xff] }
   0xb   :  { %231 = vmatmul.msk.f32.vlgmr.msra.gmra.mxu1 %vm82_vm0, %v15_v21  ;;  %235 = vmatmul.msk.f32.vlgmr.msra.gmra.mxu3 %vm82_vm0, %v15_v21  ;;  %v31_v30 = vld [vmem:[%s439_s1 + $0x48] sm:$0xff]  ;;  %v28_v32 = vld [vmem:[%s439_s1 + $0x30] sm:$0xff]  ;;  %v29_v33 = vld [vmem:[%s439_s1 + $0x38] sm:$0xff] }
   0xc   :  { %100 = vmatpush.msra.mxu0 %v42_v10  ;;  %158 = vmatpush.msra.mxu2 %v43_v11  ;;  %v26_v34 = vld [vmem:[%s439_s1 + $0x20] sm:$0xff]  ;;  %v27_v35 = vld [vmem:[%s439_s1 + $0x28] sm:$0xff]  ;;  %v60_v36 = vld [vmem:[%s441_s2 + $0x10] sm:$0xff] }
   0xd   :  { %64 = vperm.xlu0 %240, %v58_v26   ;;  %v59_v37 = vld [vmem:[%s441_s2 + $0x8] sm:$0xff]  ;;  %v24_v38 = vld [vmem:[%s439_s1 + $0x10] sm:$0xff]  ;;  %v25_v39 = vld [vmem:[%s439_s1 + $0x18] sm:$0xff]  ;;  %74 = vperm.xlu1 %241, %v60_v36  }
   0xe   :  { %101 = vmatpush.msra.mxu0 %v40_v12  ;;  %159 = vmatpush.msra.mxu2 %v41_v13  ;;  %v22_v40 = vld [vmem:[%s439_s1] sm:$0xff]  ;;  %v23_v41 = vld [vmem:[%s439_s1 + $0x8] sm:$0xff]  ;;  %v61_v44 = vld [vmem:[%s441_s2 + $0x18] sm:$0xff] }
   0xf   :  { %v14_v42 = vld [vmem:[%s440_s0] sm:$0xff]  ;;  %v19_v43 = vld [vmem:[%s440_s0 + $0x28] sm:$0xff]  ;;  %v16_v45 = vld [vmem:[%s440_s0 + $0x10] sm:$0xff] }
  0x10   :  { %102 = vmatpush.msra.mxu0 %v38_v18  ;;  %160 = vmatpush.msra.mxu2 %v39_v19  ;;  %v21_v46 = vld [vmem:[%s440_s0 + $0x38] sm:$0xff]  ;;  %v18_v47 = vld [vmem:[%s440_s0 + $0x20] sm:$0xff]  ;;  %v20_v48 = vld [vmem:[%s440_s0 + $0x30] sm:$0xff] }
  0x12   :  { %103 = vmatpush.msra.mxu0 %v36_v22  ;;  %161 = vmatpush.msra.mxu2 %v37_v23 }
  0x13   :  { %232 = vmatmul.msk.f32.gmra.mxu1 %vm82_vm0, %v17_v31  ;;  %236 = vmatmul.msk.f32.gmra.mxu3 %vm82_vm0, %v17_v31 }
  0x14   :  { %104 = vmatpush.msra.mxu0 %v34_v24  ;;  %162 = vmatpush.msra.mxu2 %v35_v25 }
  0x15   :  { %69 = vperm.xlu0 %240, %v59_v37   ;;  %79 = vperm.xlu1 %241, %v61_v44  }
  0x16   :  { %105 = vmatpush.msra.mxu0 %v32_v27  ;;  %163 = vmatpush.msra.mxu2 %v33_v28 }
  0x18   :  { %106 = vmatpush.msra.mxu0 %v30_v29  ;;  %164 = vmatpush.msra.mxu2 %v31_v30 }
  0x1a   :  { %107 = vmatpush.msra.mxu0 %v28_v32  ;;  %165 = vmatpush.msra.mxu2 %v29_v33 }
  0x1b   :  { %233 = vmatmul.msk.f32.gmra.mxu1 %vm82_vm0, %v19_v43  ;;  %237 = vmatmul.msk.f32.gmra.mxu3 %vm82_vm0, %v19_v43 }
  0x1c   :  { %108 = vmatpush.msra.mxu0 %v26_v34  ;;  %166 = vmatpush.msra.mxu2 %v27_v35 }
  0x1e   :  { %109 = vmatpush.msra.mxu0 %v24_v38  ;;  %167 = vmatpush.msra.mxu2 %v25_v39 }
  0x20   :  { %110 = vmatpush.msra.mxu0 %v22_v40  ;;  %168 = vmatpush.msra.mxu2 %v23_v41 }
  0x21   :  { %111 = vmatmul.f32.vlgmr.msra.gmra.mxu0 %v14_v42  ;;  %169 = vmatmul.f32.vlgmr.msra.gmra.mxu2 %v14_v42 }
  0x23   :  { %234 = vmatmul.msk.f32.gmra.mxu1 %vm82_vm0, %v21_v46  ;;  %238 = vmatmul.msk.f32.gmra.mxu3 %vm82_vm0, %v21_v46 }
  0x29   :  { %114 = vmatmul.f32.gmra.mxu0 %v16_v45  ;;  %172 = vmatmul.f32.gmra.mxu2 %v16_v45 }
  0x31   :  { %117 = vmatmul.f32.gmra.mxu0 %v18_v47  ;;  %175 = vmatmul.f32.gmra.mxu2 %v18_v47 }
  0x39   :  { %120 = vmatmul.f32.gmra.mxu0 %v20_v48  ;;  %178 = vmatmul.f32.gmra.mxu2 %v20_v48 }
  0x7f   :  { %v65_v50 = vpop.permute.xlu0 %64  ;;  %v75_v2 = vpop.permute.xlu1 %74 }
  0x87   :  { %v70_v58 = vpop.permute.xlu0 %69  ;;  %v80_v15 = vpop.permute.xlu1 %79 }
  0x88   :  { %v141_v49 = vpop.f32.mrf.mxu1 }
  0x8e   :  { %v199_v52 = vpop.f32.mrf.mxu3 }
  0x90   :  { %v144_v55 = vpop.f32.mrf.mxu1 }
  0x96   :  { %v202_v63 = vpop.f32.mrf.mxu3 }
  0x98   :  { %v147_v5 = vpop.f32.mrf.mxu1 }
  0x9e   :  { %v112_v51 = vpop.f32.mrf.mxu0  ;;  %v205_v12 = vpop.f32.mrf.mxu3 }
  0x9f   :  { %v113_v53 = vadd.f32 %v112_v51, %v65_v50 }
  0xa0   :  { %v150_v18 = vpop.f32.mrf.mxu1 }
  0xa1   :  { %v142_v54 = vadd.f32 %v141_v49, %v113_v53 }
  0xa3   :  { %v211_v56 = vmax.f32 %v142_v54, 0.0 }
  0xa4   :  { %v170_v57 = vpop.f32.mrf.mxu2 }
  0xa5   :  { %219 = vst [vmem:[%s442_s3] sm:$0xff] %v211_v56  ;;  %v171_v59 = vadd.f32 %v170_v57, %v65_v50 }
  0xa6   :  { %v115_v60 = vpop.f32.mrf.mxu0  ;;  %v208_v25 = vpop.f32.mrf.mxu3 }
  0xa7   :  { %v200_v61 = vadd.f32 %v199_v52, %v171_v59  ;;  %v116_v62 = vadd.f32 %v115_v60, %v70_v58 }
  0xa9   :  { %v212_v0 = vmax.f32 %v200_v61, 0.0  ;;  %v145_v1 = vadd.f32 %v144_v55, %v116_v62 }
  0xab   :  { %220 = vst [vmem:[%s442_s3 + $0x8] sm:$0xff] %v212_v0  ;;  %v213_v3 = vmax.f32 %v145_v1, 0.0 }
  0xac   :  { %v173_v4 = vpop.f32.mrf.mxu2 }
  0xad   :  { %221 = vst [vmem:[%s442_s3 + $0x10] sm:$0xff] %v213_v3  ;;  %v174_v6 = vadd.f32 %v173_v4, %v70_v58 }
  0xae   :  { %v118_v7 = vpop.f32.mrf.mxu0 }
  0xaf   :  { %v119_v8 = vadd.f32 %v118_v7, %v75_v2  ;;  %v203_v9 = vadd.f32 %v202_v63, %v174_v6 }
  0xb1   :  { %v214_v10 = vmax.f32 %v203_v9, 0.0  ;;  %v148_v11 = vadd.f32 %v147_v5, %v119_v8 }
  0xb3   :  { %222 = vst [vmem:[%s442_s3 + $0x18] sm:$0xff] %v214_v10  ;;  %v215_v13 = vmax.f32 %v148_v11, 0.0 }
  0xb4   :  { %v176_v14 = vpop.f32.mrf.mxu2 }
  0xb5   :  { %223 = vst [vmem:[%s442_s3 + $0x20] sm:$0xff] %v215_v13  ;;  %v177_v16 = vadd.f32 %v176_v14, %v75_v2 }
  0xb6   :  { %v121_v17 = vpop.f32.mrf.mxu0 }
  0xb7   :  { %v122_v19 = vadd.f32 %v121_v17, %v80_v15  ;;  %v206_v20 = vadd.f32 %v205_v12, %v177_v16 }
  0xb9   :  { %v216_v21 = vmax.f32 %v206_v20, 0.0  ;;  %v151_v22 = vadd.f32 %v150_v18, %v122_v19 }
  0xbb   :  { %224 = vst [vmem:[%s442_s3 + $0x28] sm:$0xff] %v216_v21  ;;  %v217_v23 = vmax.f32 %v151_v22, 0.0 }
  0xbc   :  { %v179_v24 = vpop.f32.mrf.mxu2 }
  0xbd   :  { %225 = vst [vmem:[%s442_s3 + $0x30] sm:$0xff] %v217_v23  ;;  %v180_v26 = vadd.f32 %v179_v24, %v80_v15 }
  0xbf   :  { %v209_v27 = vadd.f32 %v208_v25, %v180_v26 }
  0xc1   :  { %v218_v28 = vmax.f32 %v209_v27, 0.0 }
  0xc3   :  { %226 = vst [vmem:[%s442_s3 + $0x38] sm:$0xff] %v218_v28 }

// kernel: _lambda_.19
= control target key start
LH: loop header
LB: loop body
LE: loop exit
PB: predicated region body
PF: predicated region fallthrough
CT: control target
= control target key end

     0   :  { %vm104_vm0 = vcmask 261120   ;;  %vm251_vm1 = vcmask 1042432   ;;  %vm292_vm2 = vcmask 1045507   ;;  %s672_s1 = inlined_call_operand.vmem [shape: f32[288,256], index: 1, kind: input, shape index: {}]   ;;  %s673_s0 = inlined_call_operand.vmem [shape: f32[16,288], index: 0, kind: input, shape index: {}]   ;;  %s674_s2 = inlined_call_operand.vmem [shape: f32[16,1], index: 2, kind: input, shape index: {}]   ;;  %s675_s3 = inlined_call_operand.vmem [shape: f32[16,256], index: 3, kind: output, shape index: {}]  }
   0x1   :  { %v50_v0 = vld [vmem:[%s672_s1 + $0xf0] sm:$0xff]  ;;  %v48_v2 = vld [vmem:[%s672_s1 + $0xe0] sm:$0xff]  ;;  %v51_v8 = vld [vmem:[%s672_s1 + $0xf8] sm:$0xff] }
   0x2   :  { %v90_v1 = vld [vmem:[%s672_s1 + $0x230] sm:$0xff]  ;;  %111 = vmatpush.msra.mxu0 %v50_v0  ;;  %v88_v4 = vld [vmem:[%s672_s1 + $0x220] sm:$0xff]  ;;  %180 = vmatpush.msra.mxu3 %v51_v8  ;;  %v49_v12 = vld [vmem:[%s672_s1 + $0xe8] sm:$0xff] }
   0x3   :  { %169 = vmatpush.msra.mxu2 %v90_v1  ;;  %v82_v3 = vld [vmem:[%s672_s1 + $0x1f0] sm:$0xff]  ;;  %v80_v6 = vld [vmem:[%s672_s1 + $0x1e0] sm:$0xff]  ;;  %v83_v13 = vld [vmem:[%s672_s1 + $0x1f8] sm:$0xff] }
   0x4   :  { %v46_v5 = vld [vmem:[%s672_s1 + $0xd0] sm:$0xff]  ;;  %134 = vmatpush.msra.mxu1 %v82_v3  ;;  %112 = vmatpush.msra.mxu0 %v48_v2  ;;  %v44_v10 = vld [vmem:[%s672_s1 + $0xc0] sm:$0xff]  ;;  %v47_v16 = vld [vmem:[%s672_s1 + $0xd8] sm:$0xff] }
   0x5   :  { %v86_v7 = vld [vmem:[%s672_s1 + $0x210] sm:$0xff]  ;;  %170 = vmatpush.msra.mxu2 %v88_v4  ;;  %v84_v11 = vld [vmem:[%s672_s1 + $0x200] sm:$0xff]  ;;  %181 = vmatpush.msra.mxu3 %v49_v12  ;;  %v81_v17 = vld [vmem:[%s672_s1 + $0x1e8] sm:$0xff] }
   0x6   :  { %v78_v9 = vld [vmem:[%s672_s1 + $0x1d0] sm:$0xff]  ;;  %135 = vmatpush.msra.mxu1 %v80_v6  ;;  %113 = vmatpush.msra.mxu0 %v46_v5  ;;  %v76_v14 = vld [vmem:[%s672_s1 + $0x1c0] sm:$0xff]  ;;  %v45_v20 = vld [vmem:[%s672_s1 + $0xc8] sm:$0xff]  ;;  %v371_v6 = vmov 0  }
   0x7   :  { %171 = vmatpush.msra.mxu2 %v86_v7  ;;  %v42_v15 = vld [vmem:[%s672_s1 + $0xb0] sm:$0xff]  ;;  %v40_v19 = vld [vmem:[%s672_s1 + $0xa0] sm:$0xff]  ;;  %182 = vmatpush.msra.mxu3 %v47_v16  ;;  %v79_v21 = vld [vmem:[%s672_s1 + $0x1d8] sm:$0xff] }
   0x8   :  { %136 = vmatpush.msra.mxu1 %v78_v9  ;;  %114 = vmatpush.msra.mxu0 %v44_v10  ;;  %v74_v18 = vld [vmem:[%s672_s1 + $0x1b0] sm:$0xff]  ;;  %v72_v22 = vld [vmem:[%s672_s1 + $0x1a0] sm:$0xff]  ;;  %v43_v24 = vld [vmem:[%s672_s1 + $0xb8] sm:$0xff] }
   0x9   :  { %172 = vmatpush.msra.mxu2 %v84_v11  ;;  %v38_v23 = vld [vmem:[%s672_s1 + $0x90] sm:$0xff]  ;;  %183 = vmatpush.msra.mxu3 %v45_v20  ;;  %v77_v25 = vld [vmem:[%s672_s1 + $0x1c8] sm:$0xff]  ;;  %v36_v27 = vld [vmem:[%s672_s1 + $0x80] sm:$0xff] }
   0xa   :  { %137 = vmatpush.msra.mxu1 %v76_v14  ;;  %115 = vmatpush.msra.mxu0 %v42_v15  ;;  %v70_v26 = vld [vmem:[%s672_s1 + $0x190] sm:$0xff]  ;;  %v41_v28 = vld [vmem:[%s672_s1 + $0xa8] sm:$0xff]  ;;  %v75_v29 = vld [vmem:[%s672_s1 + $0x1b8] sm:$0xff] }
   0xb   :  { %203 = vmatpush.msrb.mxu2 %v83_v13  ;;  %184 = vmatpush.msra.mxu3 %v43_v24  ;;  %v68_v30 = vld [vmem:[%s672_s1 + $0x180] sm:$0xff]  ;;  %v34_v31 = vld [vmem:[%s672_s1 + $0x70] sm:$0xff]  ;;  %v39_v32 = vld [vmem:[%s672_s1 + $0x98] sm:$0xff] }
   0xc   :  { %138 = vmatpush.msra.mxu1 %v74_v18  ;;  %116 = vmatpush.msra.mxu0 %v40_v19  ;;  %v73_v33 = vld [vmem:[%s672_s1 + $0x1a8] sm:$0xff]  ;;  %v66_v34 = vld [vmem:[%s672_s1 + $0x170] sm:$0xff]  ;;  %v32_v35 = vld [vmem:[%s672_s1 + $0x60] sm:$0xff] }
   0xd   :  { %204 = vmatpush.msrb.mxu2 %v81_v17  ;;  %185 = vmatpush.msra.mxu3 %v41_v28  ;;  %v37_v36 = vld [vmem:[%s672_s1 + $0x88] sm:$0xff]  ;;  %v71_v37 = vld [vmem:[%s672_s1 + $0x198] sm:$0xff]  ;;  %v64_v38 = vld [vmem:[%s672_s1 + $0x160] sm:$0xff] }
   0xe   :  { %139 = vmatpush.msra.mxu1 %v72_v22  ;;  %117 = vmatpush.msra.mxu0 %v38_v23  ;;  %v30_v39 = vld [vmem:[%s672_s1 + $0x50] sm:$0xff]  ;;  %v35_v40 = vld [vmem:[%s672_s1 + $0x78] sm:$0xff]  ;;  %v69_v41 = vld [vmem:[%s672_s1 + $0x188] sm:$0xff] }
   0xf   :  { %205 = vmatpush.msrb.mxu2 %v79_v21  ;;  %186 = vmatpush.msra.mxu3 %v39_v32  ;;  %v62_v42 = vld [vmem:[%s672_s1 + $0x150] sm:$0xff]  ;;  %v28_v43 = vld [vmem:[%s672_s1 + $0x40] sm:$0xff]  ;;  %v33_v45 = vld [vmem:[%s672_s1 + $0x68] sm:$0xff] }
  0x10   :  { %140 = vmatpush.msra.mxu1 %v70_v26  ;;  %118 = vmatpush.msra.mxu0 %v36_v27  ;;  %v527_v44 = vld [vmem:[%s673_s0 + $0x10] sm:$0xff]  ;;  %v67_v46 = vld [vmem:[%s672_s1 + $0x178] sm:$0xff]  ;;  %v60_v48 = vld [vmem:[%s672_s1 + $0x140] sm:$0xff] }
  0x11   :  { %206 = vmatpush.msrb.mxu2 %v77_v25  ;;  %187 = vmatpush.msra.mxu3 %v37_v36  ;;  %v26_v47 = vld [vmem:[%s672_s1 + $0x30] sm:$0xff]  ;;  %v31_v49 = vld [vmem:[%s672_s1 + $0x58] sm:$0xff]  ;;  %v65_v50 = vld [vmem:[%s672_s1 + $0x168] sm:$0xff] }
  0x12   :  { %141 = vmatpush.msra.mxu1 %v68_v30  ;;  %119 = vmatpush.msra.mxu0 %v34_v31  ;;  %v24_v51 = vld [vmem:[%s672_s1 + $0x20] sm:$0xff]  ;;  %v58_v52 = vld [vmem:[%s672_s1 + $0x130] sm:$0xff]  ;;  %v29_v53 = vld [vmem:[%s672_s1 + $0x48] sm:$0xff] }
  0x13   :  { %207 = vmatpush.msrb.mxu2 %v75_v29  ;;  %188 = vmatpush.msra.mxu3 %v35_v40  ;;  %v63_v54 = vld [vmem:[%s672_s1 + $0x158] sm:$0xff]  ;;  %v22_v55 = vld [vmem:[%s672_s1 + $0x10] sm:$0xff]  ;;  %v56_v56 = vld [vmem:[%s672_s1 + $0x120] sm:$0xff] }
  0x14   :  { %142 = vmatpush.msra.mxu1 %v66_v34  ;;  %120 = vmatpush.msra.mxu0 %v32_v35  ;;  %v27_v57 = vld [vmem:[%s672_s1 + $0x38] sm:$0xff]  ;;  %v61_v58 = vld [vmem:[%s672_s1 + $0x148] sm:$0xff]  ;;  %v20_v59 = vld [vmem:[%s672_s1] sm:$0xff] }
  0x15   :  { %208 = vmatpush.msrb.mxu2 %v73_v33  ;;  %189 = vmatpush.msra.mxu3 %v33_v45  ;;  %v54_v60 = vld [vmem:[%s672_s1 + $0x110] sm:$0xff]  ;;  %v19_v61 = vld [vmem:[%s673_s0 + $0x28] sm:$0xff]  ;;  %v14_v62 = vld [vmem:[%s673_s0] sm:$0xff] }
  0x16   :  { %143 = vmatpush.msra.mxu1 %v64_v38  ;;  %121 = vmatpush.msra.mxu0 %v30_v39  ;;  %v25_v63 = vld [vmem:[%s672_s1 + $0x28] sm:$0xff]  ;;  %v59_v0 = vld [vmem:[%s672_s1 + $0x138] sm:$0xff]  ;;  %v52_v1 = vld [vmem:[%s672_s1 + $0x100] sm:$0xff] }
  0x17   :  { %209 = vmatpush.msrb.mxu2 %v71_v37  ;;  %190 = vmatpush.msra.mxu3 %v31_v49  ;;  %v15_v2 = vld [vmem:[%s673_s0 + $0x8] sm:$0xff]  ;;  %v23_v3 = vld [vmem:[%s672_s1 + $0x18] sm:$0xff]  ;;  %v18_v13 = vld [vmem:[%s673_s0 + $0x20] sm:$0xff] }
  0x18   :  { %144 = vmatpush.msra.mxu1 %v62_v42  ;;  %122 = vmatpush.msra.mxu0 %v28_v43  ;;  %v57_v4 = vld [vmem:[%s672_s1 + $0x128] sm:$0xff]  ;;  %v55_v8 = vld [vmem:[%s672_s1 + $0x118] sm:$0xff]  ;;  %v92_v15 = vld [vmem:[%s674_s2] sm:$0xff] }
  0x19   :  { %210 = vmatpush.msrb.mxu2 %v69_v41  ;;  %191 = vmatpush.msra.mxu3 %v29_v53  ;;  %v93_v5 = vld [vmem:[%s674_s2 + $0x8] sm:$0xff]  ;;  %v91_v9 = vld [vmem:[%s672_s1 + $0x238] sm:$0xff] }
  0x1a   :  { %345 = vmatmul.msk.f32.vlgmr.msra.gmra.mxu2 %vm104_vm0, %v527_v44  ;;  %123 = vmatpush.msra.mxu0 %v26_v47  ;;  %v21_v7 = vld [vmem:[%s672_s1 + $0x8] sm:$0xff]  ;;  %v17_v11 = vld [vmem:[%s673_s0 + $0x18] sm:$0xff] }
  0x1b   :  { %211 = vmatpush.msrb.mxu2 %v67_v46  ;;  %145 = vmatpush.msra.mxu1 %v60_v48  ;;  %v53_v10 = vld [vmem:[%s672_s1 + $0x108] sm:$0xff]  ;;  %v87_v14 = vld [vmem:[%s672_s1 + $0x218] sm:$0xff] }
  0x1c   :  { %124 = vmatpush.msra.mxu0 %v24_v51  ;;  %192 = vmatpush.msra.mxu3 %v27_v57  ;;  %v89_v12 = vld [vmem:[%s672_s1 + $0x228] sm:$0xff] }
  0x1d   :  { %212 = vmatpush.msrb.mxu2 %v65_v50  ;;  %146 = vmatpush.msra.mxu1 %v58_v52  ;;  %v85_v16 = vld [vmem:[%s672_s1 + $0x208] sm:$0xff] }
  0x1e   :  { %125 = vmatpush.msra.mxu0 %v22_v55  ;;  %193 = vmatpush.msra.mxu3 %v25_v63 }
  0x1f   :  { %213 = vmatpush.msrb.mxu2 %v63_v54  ;;  %147 = vmatpush.msra.mxu1 %v56_v56 }
  0x20   :  { %126 = vmatpush.msra.mxu0 %v20_v59  ;;  %354 = vset.pattern.permute.xlu0 %v371_v6 }
  0x21   :  { %214 = vmatpush.msrb.mxu2 %v61_v58  ;;  %148 = vmatpush.msra.mxu1 %v54_v60 }
  0x22   :  { %346 = vmatmul.msk.f32.gmra.mxu2 %vm104_vm0, %v19_v61  ;;  %127 = vmatmul.f32.vlgmr.msra.gmra.mxu0 %v14_v62 }
  0x23   :  { %215 = vmatpush.msrb.mxu2 %v59_v0  ;;  %149 = vmatpush.msra.mxu1 %v52_v1 }
  0x24   :  { %150 = vmatmul.f32.vlgmr.msra.gmra.mxu1 %v15_v2  ;;  %194 = vmatpush.msra.mxu3 %v23_v3 }
  0x25   :  { %216 = vmatpush.msrb.mxu2 %v57_v4  ;;  %101 = vperm.xlu0 %354, %v93_v5  }
  0x26   :  { %195 = vmatpush.msra.mxu3 %v21_v7  ;;  %349 = vmatpush.msrb.mxu1 %v91_v9 }
  0x27   :  { %217 = vmatpush.msrb.mxu2 %v55_v8  ;;  %196 = vmatmul.f32.vlgmr.msra.gmra.mxu3 %v14_v62 }
  0x28   :  { %238 = vmatpush.msrb.mxu0 %v91_v9  ;;  %350 = vmatpush.msrb.mxu1 %v89_v12 }
  0x29   :  { %218 = vmatpush.msrb.mxu2 %v53_v10 }
  0x2a   :  { %130 = vmatmul.f32.gmra.mxu0 %v17_v11  ;;  %219 = vmatmul.f32.vlgmr.msrb.gmra.mxu2 %v15_v2 }
  0x2b   :  { %239 = vmatpush.msrb.mxu0 %v89_v12  ;;  %351 = vmatpush.msrb.mxu1 %v87_v14 }
  0x2c   :  { %153 = vmatmul.f32.gmra.mxu1 %v18_v13 }
  0x2d   :  { %240 = vmatpush.msrb.mxu0 %v87_v14  ;;  %96 = vperm.xlu0 %354, %v92_v15  }
  0x2e   :  { %352 = vmatpush.msrb.mxu1 %v85_v16 }
  0x2f   :  { %241 = vmatpush.msrb.mxu0 %v85_v16  ;;  %199 = vmatmul.f32.gmra.mxu3 %v17_v11 }
  0x32   :  { %347 = vmatmul.msk.f32.vlgmr.msrb.gmra.mxu0 %vm104_vm0, %v527_v44  ;;  %222 = vmatmul.f32.gmra.mxu2 %v18_v13 }
  0x34   :  { %348 = vmatmul.msk.f32.vlgmr.msrb.gmra.mxu1 %vm104_vm0, %v19_v61 }
  0x97   :  { %v102_v17 = vpop.permute.xlu0 %101 }
  0x9d   :  { %v174_v18 = vpop.f32.mrf.mxu2 }
  0x9f   :  { %v128_v19 = vpop.f32.mrf.mxu0  ;;  %v97_v20 = vpop.permute.xlu0 %96 }
  0xa0   :  { %v129_v21 = vadd.f32 %v128_v19, %v97_v20 }
  0xa1   :  { %v151_v22 = vpop.f32.mrf.mxu1 }
  0xa2   :  { %v152_v23 = vadd.f32 %v151_v22, %v129_v21 }
  0xa4   :  { %v175_v24 = vadd.f32 %v174_v18, %v152_v23 }
  0xa5   :  { %v177_v25 = vpop.f32.mrf.mxu2 }
  0xa6   :  { %249 = vst [vmem:[%s675_s3] sm:$0xff] %v175_v24 }
  0xa7   :  { %v131_v26 = vpop.f32.mrf.mxu0 }
  0xa8   :  { %v132_v27 = vadd.f32 %v131_v26, %v102_v17 }
  0xa9   :  { %v154_v28 = vpop.f32.mrf.mxu1 }
  0xaa   :  { %v155_v29 = vadd.f32 %v154_v28, %v132_v27  ;;  %v197_v30 = vpop.f32.mrf.mxu3 }
  0xab   :  { %v198_v31 = vadd.f32 %v197_v30, %v97_v20 }
  0xac   :  { %v178_v32 = vadd.f32 %v177_v25, %v155_v29 }
  0xad   :  { %v220_v33 = vpop.f32.mrf.mxu2 }
  0xae   :  { %v252_v34 = vsel %vm251_vm1, %v178_v32, -inf  ;;  %339 = vst [vmem:[%s675_s3 + $0x10] sm:$0xc0] %v178_v32  ;;  %v221_v35 = vadd.f32 %v220_v33, %v198_v31  ;;  %v293_v37 = vsel %vm292_vm2, %v178_v32, -inf }
  0xaf   :  { %v243_v36 = vpop.f32.mrf.mxu0  ;;  %v253_v38 = vrot.slane %v252_v34, 4  ;;  %v294_v39 = vrot.slane %v293_v37, 4 }
  0xb0   :  { %v244_v40 = vadd.f32 %v243_v36, %v221_v35 }
  0xb1   :  { %v254_v41 = vmax.f32 %v252_v34, %v253_v38  ;;  %v295_v42 = vmax.f32 %v293_v37, %v294_v39  ;;  %v246_v49 = vpop.f32.mrf.mxu1 }
  0xb2   :  { %250 = vst [vmem:[%s675_s3 + $0x8] sm:$0xff] %v244_v40  ;;  %v200_v43 = vpop.f32.mrf.mxu3 }
  0xb3   :  { %v255_v44 = vrot.slane %v254_v41, 2  ;;  %v201_v45 = vadd.f32 %v200_v43, %v102_v17  ;;  %v296_v46 = vrot.slane %v295_v42, 2 }
  0xb5   :  { %v256_v47 = vmax.f32 %v254_v41, %v255_v44  ;;  %v223_v48 = vpop.f32.mrf.mxu2  ;;  %v297_v50 = vmax.f32 %v295_v42, %v296_v46 }
  0xb6   :  { %v224_v51 = vadd.f32 %v223_v48, %v201_v45 }
  0xb7   :  { %v257_v52 = vrot.slane %v256_v47, 1  ;;  %v298_v53 = vrot.slane %v297_v50, 1 }
  0xb8   :  { %v247_v54 = vadd.f32 %v246_v49, %v224_v51 }
  0xb9   :  { %v258_v55 = vmax.f32 %v256_v47, %v257_v52  ;;  %v299_v56 = vmax.f32 %v297_v50, %v298_v53 }
  0xba   :  { %v259_v57 = vsel %vm251_vm1, %v247_v54, -inf  ;;  %v300_v58 = vsel %vm292_vm2, %v247_v54, -inf  ;;  %340 = vst [vmem:[%s675_s3 + $0x18] sm:$0xc0] %v247_v54 }
  0xbb   :  { %v266_v59 = vsub.f32 %v178_v32, %v258_v55  ;;  %v260_v60 = vrot.slane %v259_v57, 4  ;;  %v301_v61 = vrot.slane %v300_v58, 4  ;;  %v307_v62 = vsub.f32 %v178_v32, %v299_v56 }
  0xbd   :  { %v268_v63 = vmul.f32 1.442695, %v266_v59  ;;  %v261_v0 = vmax.f32 %v259_v57, %v260_v60  ;;  %v302_v1 = vmax.f32 %v300_v58, %v301_v61  ;;  %v309_v2 = vmul.f32 1.442695, %v307_v62 }
  0xbf   :  { %355 = vpow2.f32 %v268_v63  ;;  %v262_v3 = vrot.slane %v261_v0, 2  ;;  %v303_v4 = vrot.slane %v302_v1, 2 }
  0xc0   :  { %357 = vpow2.f32 %v309_v2 }
  0xc1   :  { %v263_v5 = vmax.f32 %v261_v0, %v262_v3  ;;  %v304_v6 = vmax.f32 %v302_v1, %v303_v4 }
  0xc3   :  { %v264_v7 = vrot.slane %v263_v5, 1  ;;  %v305_v8 = vrot.slane %v304_v6, 1 }
  0xc5   :  { %v356_v9 = vpop.eup %355  ;;  %v265_v10 = vmax.f32 %v263_v5, %v264_v7  ;;  %v306_v11 = vmax.f32 %v304_v6, %v305_v8 }
  0xc6   :  { %v358_v12 = vpop.eup %357  ;;  %v272_v13 = vsel %vm251_vm1, %v356_v9, 0.0 }
  0xc7   :  { %v273_v14 = vrot.slane %v272_v13, 4  ;;  %v267_v15 = vsub.f32 %v247_v54, %v265_v10  ;;  %v308_v16 = vsub.f32 %v247_v54, %v306_v11  ;;  %v315_v17 = vrot.slane %v358_v12, 3 }
  0xc9   :  { %v274_v18 = vadd.f32 %v273_v14, %v272_v13  ;;  %v270_v19 = vmul.f32 1.442695, %v267_v15  ;;  %v311_v20 = vmul.f32 1.442695, %v308_v16  ;;  %v319_v21 = vsel %vm251_vm1, %v315_v17, 0.0 }
  0xca   :  { %v320_v22 = vrot.slane %v319_v21, 4 }
  0xcb   :  { %v275_v23 = vrot.slane %v274_v18, 2  ;;  %359 = vpow2.f32 %v270_v19 }
  0xcc   :  { %361 = vpow2.f32 %v311_v20  ;;  %v321_v24 = vadd.f32 %v320_v22, %v319_v21 }
  0xcd   :  { %v276_v25 = vadd.f32 %v275_v23, %v274_v18 }
  0xce   :  { %v322_v26 = vrot.slane %v321_v24, 2 }
  0xcf   :  { %v277_v27 = vrot.slane %v276_v25, 1 }
  0xd0   :  { %v323_v28 = vadd.f32 %v322_v26, %v321_v24 }
  0xd1   :  { %v360_v29 = vpop.eup %359  ;;  %v278_v30 = vadd.f32 %v277_v27, %v276_v25 }
  0xd2   :  { %v362_v31 = vpop.eup %361  ;;  %v279_v32 = vsel %vm251_vm1, %v360_v29, 0.0  ;;  %v324_v33 = vrot.slane %v323_v28, 1 }
  0xd3   :  { %363 = vrcp.f32 %v278_v30  ;;  %v280_v34 = vrot.slane %v279_v32, 4  ;;  %v316_v35 = vrot.slane %v362_v31, 3 }
  0xd4   :  { %v325_v36 = vadd.f32 %v324_v33, %v323_v28 }
  0xd5   :  { %v281_v37 = vadd.f32 %v280_v34, %v279_v32  ;;  %v326_v38 = vsel %vm251_vm1, %v316_v35, 0.0 }
  0xd6   :  { %v327_v39 = vrot.slane %v326_v38, 4  ;;  %365 = vrcp.f32 %v325_v36 }
  0xd7   :  { %v282_v40 = vrot.slane %v281_v37, 2 }
  0xd8   :  { %v328_v41 = vadd.f32 %v327_v39, %v326_v38 }
  0xd9   :  { %v364_v42 = vpop.eup %363  ;;  %v283_v43 = vadd.f32 %v282_v40, %v281_v37 }
  0xda   :  { %v288_v44 = vmul.f32 %v364_v42, %v356_v9  ;;  %v329_v45 = vrot.slane %v328_v41, 2 }
  0xdb   :  { %v284_v46 = vrot.slane %v283_v43, 1 }
  0xdc   :  { %v366_v47 = vpop.eup %365  ;;  %290 = vst [vmem:[%s675_s3 + $0x10] sm:$0x7] %v288_v44  ;;  %v330_v48 = vadd.f32 %v329_v45, %v328_v41 }
  0xdd   :  { %v285_v49 = vadd.f32 %v284_v46, %v283_v43  ;;  %v335_v50 = vmul.f32 %v366_v47, %v358_v12 }
  0xde   :  { %v331_v51 = vrot.slane %v330_v48, 1 }
  0xdf   :  { %367 = vrcp.f32 %v285_v49  ;;  %337 = vst [vmem:[%s675_s3 + $0x10] sm:$0x38] %v335_v50 }
  0xe0   :  { %v332_v52 = vadd.f32 %v331_v51, %v330_v48 }
  0xe2   :  { %369 = vrcp.f32 %v332_v52 }
  0xe5   :  { %v368_v53 = vpop.eup %367 }
  0xe6   :  { %v289_v54 = vmul.f32 %v368_v53, %v360_v29 }
  0xe8   :  { %v370_v55 = vpop.eup %369  ;;  %291 = vst [vmem:[%s675_s3 + $0x18] sm:$0x7] %v289_v54 }
  0xe9   :  { %v336_v56 = vmul.f32 %v370_v55, %v362_v31 }
  0xeb   :  { %338 = vst [vmem:[%s675_s3 + $0x18] sm:$0x38] %v336_v56 }

</bundles_post_ra>
